<compile_context>
chip_gen: v7x
topology: tpu7x:2x2x1
jax: 0.10.0
libtpu: 0.0.40
codegen_flags: <defaults>
</compile_context>

<pallas_src>
import functools

import jax
import jax.numpy as jnp
from jax.experimental import pallas as pl
from jax.experimental.pallas import tpu as pltpu

LANE = 128


def _round_up(x, m):
    return ((x + m - 1) // m) * m


def _pad2d(a, rows, cols, dtype=jnp.float32):
    a = a.astype(dtype)
    return jnp.pad(a, ((0, rows - a.shape[0]), (0, cols - a.shape[1])))


# ----------------------------------------------------------------------------
# Fused rollout kernel: one grid step == one rollout step (both DynEm layers).
# ----------------------------------------------------------------------------
def _gnn_rollout_kernel(rw_ref, h0i_ref, gd_ref, gs_ref, s_ref,
                        w1dh_ref, w1dr_ref, w1sh_ref, w1sr_ref,
                        w2d_ref, w2s_ref, c1_ref, c2_ref,
                        eh_ref, ey_ref, out_ref, h0_scr):
    t = pl.program_id(0)
    bf16 = jnp.bfloat16
    f32 = jnp.float32

    # Initialize the h0 carry on the first step; it persists in VMEM scratch.
    @pl.when(t == 0)
    def _():
        h0_scr[...] = h0i_ref[...]

    h0 = h0_scr[...]                         # [Np, HP] f32 (carry, cols 0:SB valid)
    h0_b = h0.astype(bf16)
    rw = rw_ref[0]                           # [Np, WP] bf16 (this step's runoff window)

    # ---- layer 1: node-side projections  x @ W1_dst / W1_src -------------
    t1d = (jnp.dot(h0_b, w1dh_ref[...], preferred_element_type=f32)
           + jnp.dot(rw, w1dr_ref[...], preferred_element_type=f32))
    t1s = (jnp.dot(h0_b, w1sh_ref[...], preferred_element_type=f32)
           + jnp.dot(rw, w1sr_ref[...], preferred_element_type=f32))
    # gather to edges (dense one-hot matmul), add attr/bias term, ReLU (f32)
    m1 = jnp.maximum(
        jnp.dot(gd_ref[...], t1d.astype(bf16), preferred_element_type=f32)
        + jnp.dot(gs_ref[...], t1s.astype(bf16), preferred_element_type=f32)
        + c1_ref[...], 0.0)
    # scatter-add aggregation at target nodes:  S[N,E] @ msg[E,F]
    out_mp = jnp.dot(s_ref[...], m1.astype(bf16), preferred_element_type=f32)

    # ---- layer 2 (same pattern; out_mp is the node feature) ---------------
    o_b = out_mp.astype(bf16)
    t2d = jnp.dot(o_b, w2d_ref[...], preferred_element_type=f32)
    t2s = jnp.dot(o_b, w2s_ref[...], preferred_element_type=f32)
    m2 = jnp.maximum(
        jnp.dot(gd_ref[...], t2d.astype(bf16), preferred_element_type=f32)
        + jnp.dot(gs_ref[...], t2s.astype(bf16), preferred_element_type=f32)
        + c2_ref[...], 0.0)
    y = jnp.dot(s_ref[...], m2.astype(bf16), preferred_element_type=f32)

    out_ref[0] = y

    # h0 carry:  new_h0 = cat([h0, y])[:, -SB:]  expressed as two exact
    # (one nonzero per column) f32 selection matmuls -> no lane shifts.
    h0_scr[...] = (jnp.dot(h0, eh_ref[...], preferred_element_type=f32)
                   + jnp.dot(y, ey_ref[...], preferred_element_type=f32))


# ----------------------------------------------------------------------------
# Forward pass (mirrors the PyTorch loop exactly, but as ONE pallas_call).
# ----------------------------------------------------------------------------
def gnn_model_forward(params, edge_index, x, norm_elev, norm_length,
                      norm_geom_1, norm_in_offset, norm_out_offset,
                      steps_behind, prediction_steps):
    f32, bf16 = jnp.float32, jnp.bfloat16

    N = x.shape[0]
    SB = steps_behind
    P = prediction_steps
    Lw = 2 * SB + P            # length_window
    W_win = P + SB             # width of the per-step runoff slice

    runoff = x[:, SB:]
    L = runoff.shape[1] - SB   # length_simulation
    assert L % P == 0, "length_simulation must be a multiple of prediction_steps"
    num_steps = L // P

    src = edge_index[0]
    dst = edge_index[1]
    E = src.shape[0]

    # ---- padded sizes: lane-dense 128 everywhere --------------------------
    Np = _round_up(N, LANE)
    Ep = _round_up(E, LANE)
    HP = _round_up(SB, LANE)          # padded h0 width
    WP = _round_up(W_win, LANE)       # padded runoff-window width
    O1 = params["W1"].shape[1]
    O2 = params["W2"].shape[1]
    O1p = _round_up(O1, LANE)
    O2p = _round_up(O2, LANE)

    # ---- loop-invariant edge attributes (built once) ----------------------
    # TODO(synk): exact DynEm edge-attribute definition unavailable.
    attr1 = (norm_elev[src] + norm_out_offset) - (norm_elev[dst] + norm_in_offset)
    attr2 = norm_geom_1 * norm_length
    attrs = jnp.stack([attr1, attr2], axis=1).astype(f32)         # [E, 2]

    # ---- loop-invariant gather/scatter one-hots (bf16 0/1 is exact) -------
    gd = jax.nn.one_hot(dst, N, dtype=f32)                        # [E, N]
    gs = jax.nn.one_hot(src, N, dtype=f32)
    Gd = _pad2d(gd, Ep, Np, bf16)
    Gs = _pad2d(gs, Ep, Np, bf16)
    S = _pad2d(gd.T, Np, Ep, bf16)                                # scatter-add

    # ---- loop-invariant weight splits + padding (built once, bf16) --------
    W1 = params["W1"].astype(f32); b1 = params["b1"].astype(f32)
    W2 = params["W2"].astype(f32); b2 = params["b2"].astype(f32)
    W1_dst, W1_src, w1_a = W1[:Lw], W1[Lw:2 * Lw], W1[2 * Lw:2 * Lw + 2]
    W2_dst, W2_src, w2_a = W2[:O1], W2[O1:2 * O1], W2[2 * O1:2 * O1 + 2]

    W1dh = _pad2d(W1_dst[:SB], HP, O1p, bf16)
    W1dr = _pad2d(W1_dst[SB:], WP, O1p, bf16)
    W1sh = _pad2d(W1_src[:SB], HP, O1p, bf16)
    W1sr = _pad2d(W1_src[SB:], WP, O1p, bf16)
    W2d = _pad2d(W2_dst, O1p, O2p, bf16)
    W2s = _pad2d(W2_src, O1p, O2p, bf16)

    # Per-edge attr/bias terms (f32); padded edge rows are zero, so padded
    # edges produce relu(0)=0 messages and cannot contaminate the sum.
    c1 = _pad2d(attrs @ w1_a + b1[None, :], Ep, O1p, f32)
    c2 = _pad2d(attrs @ w2_a + b2[None, :], Ep, O2p, f32)

    # Selection matrices for  new_h0 = cat([h0, y])[:, -SB:]
    Eh = jnp.zeros((HP, HP), f32)
    Ey = jnp.zeros((O2p, HP), f32)
    for i in range(SB):
        j = P + i                       # source column in cat([h0, y])
        if j < SB:
            Eh = Eh.at[j, i].set(1.0)
        else:
            Ey = Ey.at[j - SB, i].set(1.0)

    # ---- per-step runoff windows (stacked once; leading axis == grid) -----
    h0_init = _pad2d(x[:, :SB], Np, HP, f32)
    wins = jnp.stack([runoff[:, t * P: t * P + W_win] for t in range(num_steps)],
                     axis=0)                                      # [T, N, W]
    rw = jnp.pad(wins.astype(bf16), ((0, 0), (0, Np - N), (0, WP - W_win)))

    def res(shape):  # step-invariant, VMEM-resident block
        return pl.BlockSpec(shape, lambda t: tuple(0 for _ in shape))

    out = pl.pallas_call(
        _gnn_rollout_kernel,
        out_shape=jax.ShapeDtypeStruct((num_steps, Np, O2p), f32),
        grid_spec=pltpu.PrefetchScalarGridSpec(
            num_scalar_prefetch=0,
            grid=(num_steps,),
            in_specs=[
                pl.BlockSpec((1, Np, WP), lambda t: (t, 0, 0)),   # runoff windows
                res((Np, HP)),                                    # h0_init
                res((Ep, Np)),                                    # Gd
                res((Ep, Np)),                                    # Gs
                res((Np, Ep)),                                    # S
                res((HP, O1p)),                                   # W1 dst (h0 rows)
                res((WP, O1p)),                                   # W1 dst (runoff rows)
                res((HP, O1p)),                                   # W1 src (h0 rows)
                res((WP, O1p)),                                   # W1 src (runoff rows)
                res((O1p, O2p)),                                  # W2 dst
                res((O1p, O2p)),                                  # W2 src
                res((Ep, O1p)),                                   # c1 (attrs@Wa + b1)
                res((Ep, O2p)),                                   # c2 (attrs@Wa + b2)
                res((HP, HP)),                                    # Eh
                res((O2p, HP)),                                   # Ey
            ],
            out_specs=pl.BlockSpec((1, Np, O2p), lambda t: (t, 0, 0)),
            scratch_shapes=[pltpu.VMEM((Np, HP), f32)],           # h0 carry
        ),
        compiler_params=pltpu.CompilerParams(
            # steps are serially dependent through h0 -> must stay sequential
            dimension_semantics=("arbitrary",),
            vmem_limit_bytes=32 * 1024 * 1024,                    # safe on v5e/v6e/v7x
        ),
    )(rw, h0_init, Gd, Gs, S, W1dh, W1dr, W1sh, W1sr, W2d, W2s, c1, c2, Eh, Ey)

    # [T, Np, O2p] -> [N, T*P]  (pred[:, t*P:(t+1)*P] = y_t)
    pred = out[:, :N, :P].transpose(1, 0, 2).reshape(N, num_steps * P)
    return pred


def init_params(key, steps_behind, prediction_steps):
    length_window = 2 * steps_behind + prediction_steps
    in1 = 2 * length_window + 2
    out1 = 5
    in2 = 2 * 5 + 2
    out2 = prediction_steps

    k1, k2, k3, k4 = jax.random.split(key, 4)
    s1 = 1.0 / jnp.sqrt(in1)
    s2 = 1.0 / jnp.sqrt(in2)
    return {
        "W1": jax.random.uniform(k1, (in1, out1), jnp.float32, -s1, s1),
        "b1": jax.random.uniform(k2, (out1,), jnp.float32, -s1, s1),
        "W2": jax.random.uniform(k3, (in2, out2), jnp.float32, -s2, s2),
        "b2": jax.random.uniform(k4, (out2,), jnp.float32, -s2, s2),
    }


if __name__ == "__main__":
    steps_behind = 2
    prediction_steps = 4
    num_nodes = 8
    num_edges = 16
    length_simulation = 8  # two rollout iterations of prediction_steps=4

    key = jax.random.PRNGKey(0)
    (k_x, k_ei, k_el, k_len, k_g1, k_in, k_out, k_p) = jax.random.split(key, 8)

    # node time-series: [N, steps_behind + length_simulation + steps_behind]
    x = jax.random.normal(
        k_x, (num_nodes, steps_behind + length_simulation + steps_behind),
        dtype=jnp.float32)
    edge_index = jax.random.randint(k_ei, (2, num_edges), 0, num_nodes)
    norm_elev = jax.random.normal(k_el, (num_nodes,), dtype=jnp.float32)
    norm_length = jax.random.uniform(k_len, (num_edges,), dtype=jnp.float32)
    norm_geom_1 = jax.random.uniform(k_g1, (num_edges,), dtype=jnp.float32)
    norm_in_offset = jax.random.normal(k_in, (num_edges,), dtype=jnp.float32)
    norm_out_offset = jax.random.normal(k_out, (num_edges,), dtype=jnp.float32)

    params = init_params(k_p, steps_behind, prediction_steps)

    fwd = jax.jit(functools.partial(gnn_model_forward,
                                    steps_behind=steps_behind,
                                    prediction_steps=prediction_steps))
    pred = fwd(params, edge_index, x, norm_elev, norm_length, norm_geom_1,
               norm_in_offset, norm_out_offset)
    pred = jax.block_until_ready(pred)

    assert pred.shape == (num_nodes, length_simulation), pred.shape
    assert pred.dtype == jnp.float32
    print("KERNEL_OK")
</pallas_src>

<mosaic_0001>
module attributes {stable_mosaic.version = 11 : i64} {
  func.func @_gnn_rollout_kernel(%arg0: i32, %arg1: memref<1x128x128xbf16, #tpu.memory_space<vmem>>, %arg2: memref<128x128xf32, #tpu.memory_space<vmem>>, %arg3: memref<128x128xbf16, #tpu.memory_space<vmem>>, %arg4: memref<128x128xbf16, #tpu.memory_space<vmem>>, %arg5: memref<128x128xbf16, #tpu.memory_space<vmem>>, %arg6: memref<128x128xbf16, #tpu.memory_space<vmem>>, %arg7: memref<128x128xbf16, #tpu.memory_space<vmem>>, %arg8: memref<128x128xbf16, #tpu.memory_space<vmem>>, %arg9: memref<128x128xbf16, #tpu.memory_space<vmem>>, %arg10: memref<128x128xbf16, #tpu.memory_space<vmem>>, %arg11: memref<128x128xbf16, #tpu.memory_space<vmem>>, %arg12: memref<128x128xf32, #tpu.memory_space<vmem>>, %arg13: memref<128x128xf32, #tpu.memory_space<vmem>>, %arg14: memref<128x128xf32, #tpu.memory_space<vmem>>, %arg15: memref<128x128xf32, #tpu.memory_space<vmem>>, %arg16: memref<1x128x128xf32, #tpu.memory_space<vmem>>, %arg17: memref<128x128xf32, #tpu.memory_space<vmem>>) attributes {dimension_semantics = [#tpu.dimension_semantics<arbitrary>], iteration_bounds = array<i64: 2>, scalar_prefetch = 0 : i64, scratch_operands = 1 : i64, tpu.core_type = #tpu.core_type<tc>, window_params = [{transform_indices = @transform_0, window_bounds = array<i64: 1, 128, 128>}, {pipeline_mode = #tpu.pipeline_mode<synchronous>, transform_indices = @transform_1, window_bounds = array<i64: 128, 128>}, {pipeline_mode = #tpu.pipeline_mode<synchronous>, transform_indices = @transform_2, window_bounds = array<i64: 128, 128>}, {pipeline_mode = #tpu.pipeline_mode<synchronous>, transform_indices = @transform_3, window_bounds = array<i64: 128, 128>}, {pipeline_mode = #tpu.pipeline_mode<synchronous>, transform_indices = @transform_4, window_bounds = array<i64: 128, 128>}, {pipeline_mode = #tpu.pipeline_mode<synchronous>, transform_indices = @transform_5, window_bounds = array<i64: 128, 128>}, {pipeline_mode = #tpu.pipeline_mode<synchronous>, transform_indices = @transform_6, window_bounds = array<i64: 128, 128>}, {pipeline_mode = #tpu.pipeline_mode<synchronous>, transform_indices = @transform_7, window_bounds = array<i64: 128, 128>}, {pipeline_mode = #tpu.pipeline_mode<synchronous>, transform_indices = @transform_8, window_bounds = array<i64: 128, 128>}, {pipeline_mode = #tpu.pipeline_mode<synchronous>, transform_indices = @transform_9, window_bounds = array<i64: 128, 128>}, {pipeline_mode = #tpu.pipeline_mode<synchronous>, transform_indices = @transform_10, window_bounds = array<i64: 128, 128>}, {pipeline_mode = #tpu.pipeline_mode<synchronous>, transform_indices = @transform_11, window_bounds = array<i64: 128, 128>}, {pipeline_mode = #tpu.pipeline_mode<synchronous>, transform_indices = @transform_12, window_bounds = array<i64: 128, 128>}, {pipeline_mode = #tpu.pipeline_mode<synchronous>, transform_indices = @transform_13, window_bounds = array<i64: 128, 128>}, {pipeline_mode = #tpu.pipeline_mode<synchronous>, transform_indices = @transform_14, window_bounds = array<i64: 128, 128>}, {transform_indices = @transform_15, window_bounds = array<i64: 1, 128, 128>}]} {
    %c0_i32 = arith.constant 0 : i32
    %0 = arith.cmpi eq, %arg0, %c0_i32 : i32
    %1 = arith.extui %0 : i1 to i32
    %c0_i32_0 = arith.constant 0 : i32
    %2 = arith.cmpi ne, %1, %c0_i32_0 : i32
    scf.if %2 {
      %c0_57 = arith.constant 0 : index
      %c0_58 = arith.constant 0 : index
      %59 = vector.load %arg2[%c0_57, %c0_58] : memref<128x128xf32, #tpu.memory_space<vmem>>, vector<128x128xf32>
      %c0_59 = arith.constant 0 : index
      %c0_60 = arith.constant 0 : index
      %60 = vector.load %arg17[%c0_59, %c0_60] : memref<128x128xf32, #tpu.memory_space<vmem>>, vector<128x128xf32>
      tpu.vector_store %arg17[%c0_59, %c0_60], %59 {strides = array<i32>} : memref<128x128xf32, #tpu.memory_space<vmem>>, vector<128x128xf32>,
    } else {
    }
    %c0 = arith.constant 0 : index
    %c0_1 = arith.constant 0 : index
    %3 = vector.load %arg17[%c0, %c0_1] : memref<128x128xf32, #tpu.memory_space<vmem>>, vector<128x128xf32>
    %4 = arith.truncf %3 : vector<128x128xf32> to vector<128x128xbf16>
    %c0_2 = arith.constant 0 : index
    %c0_3 = arith.constant 0 : index
    %c0_4 = arith.constant 0 : index
    %5 = vector.load %arg1[%c0_2, %c0_3, %c0_4] : memref<1x128x128xbf16, #tpu.memory_space<vmem>>, vector<1x128x128xbf16>
    %6 = vector.shape_cast %5 : vector<1x128x128xbf16> to vector<128x128xbf16>
    %c0_5 = arith.constant 0 : index
    %c0_6 = arith.constant 0 : index
    %7 = vector.load %arg6[%c0_5, %c0_6] : memref<128x128xbf16, #tpu.memory_space<vmem>>, vector<128x128xbf16>
    %cst = arith.constant dense<0.000000e+00> : vector<128x128xf32>
    %8 = tpu.matmul %4, %7, %cst {dimension_numbers = #tpu.dot_dimension_numbers<[1], [0], [0], [1], [0, 0, 1, 1], [], []>} : vector<128x128xbf16>, vector<128x128xbf16>, vector<128x128xf32> -> vector<128x128xf32>
    %c0_7 = arith.constant 0 : index
    %c0_8 = arith.constant 0 : index
    %9 = vector.load %arg7[%c0_7, %c0_8] : memref<128x128xbf16, #tpu.memory_space<vmem>>, vector<128x128xbf16>
    %cst_9 = arith.constant dense<0.000000e+00> : vector<128x128xf32>
    %10 = tpu.matmul %6, %9, %cst_9 {dimension_numbers = #tpu.dot_dimension_numbers<[1], [0], [0], [1], [0, 0, 1, 1], [], []>} : vector<128x128xbf16>, vector<128x128xbf16>, vector<128x128xf32> -> vector<128x128xf32>
    %11 = arith.addf %8, %10 : vector<128x128xf32>
    %c0_10 = arith.constant 0 : index
    %c0_11 = arith.constant 0 : index
    %12 = vector.load %arg8[%c0_10, %c0_11] : memref<128x128xbf16, #tpu.memory_space<vmem>>, vector<128x128xbf16>
    %cst_12 = arith.constant dense<0.000000e+00> : vector<128x128xf32>
    %13 = tpu.matmul %4, %12, %cst_12 {dimension_numbers = #tpu.dot_dimension_numbers<[1], [0], [0], [1], [0, 0, 1, 1], [], []>} : vector<128x128xbf16>, vector<128x128xbf16>, vector<128x128xf32> -> vector<128x128xf32>
    %c0_13 = arith.constant 0 : index
    %c0_14 = arith.constant 0 : index
    %14 = vector.load %arg9[%c0_13, %c0_14] : memref<128x128xbf16, #tpu.memory_space<vmem>>, vector<128x128xbf16>
    %cst_15 = arith.constant dense<0.000000e+00> : vector<128x128xf32>
    %15 = tpu.matmul %6, %14, %cst_15 {dimension_numbers = #tpu.dot_dimension_numbers<[1], [0], [0], [1], [0, 0, 1, 1], [], []>} : vector<128x128xbf16>, vector<128x128xbf16>, vector<128x128xf32> -> vector<128x128xf32>
    %16 = arith.addf %13, %15 : vector<128x128xf32>
    %c0_16 = arith.constant 0 : index
    %c0_17 = arith.constant 0 : index
    %17 = vector.load %arg3[%c0_16, %c0_17] : memref<128x128xbf16, #tpu.memory_space<vmem>>, vector<128x128xbf16>
    %18 = arith.truncf %11 : vector<128x128xf32> to vector<128x128xbf16>
    %cst_18 = arith.constant dense<0.000000e+00> : vector<128x128xf32>
    %19 = tpu.matmul %17, %18, %cst_18 {dimension_numbers = #tpu.dot_dimension_numbers<[1], [0], [0], [1], [0, 0, 1, 1], [], []>} : vector<128x128xbf16>, vector<128x128xbf16>, vector<128x128xf32> -> vector<128x128xf32>
    %c0_19 = arith.constant 0 : index
    %c0_20 = arith.constant 0 : index
    %20 = vector.load %arg4[%c0_19, %c0_20] : memref<128x128xbf16, #tpu.memory_space<vmem>>, vector<128x128xbf16>
    %21 = arith.truncf %16 : vector<128x128xf32> to vector<128x128xbf16>
    %cst_21 = arith.constant dense<0.000000e+00> : vector<128x128xf32>
    %22 = tpu.matmul %20, %21, %cst_21 {dimension_numbers = #tpu.dot_dimension_numbers<[1], [0], [0], [1], [0, 0, 1, 1], [], []>} : vector<128x128xbf16>, vector<128x128xbf16>, vector<128x128xf32> -> vector<128x128xf32>
    %23 = arith.addf %19, %22 : vector<128x128xf32>
    %c0_22 = arith.constant 0 : index
    %c0_23 = arith.constant 0 : index
    %24 = vector.load %arg12[%c0_22, %c0_23] : memref<128x128xf32, #tpu.memory_space<vmem>>, vector<128x128xf32>
    %25 = arith.addf %23, %24 : vector<128x128xf32>
    %cst_24 = arith.constant 0.000000e+00 : f32
    %26 = vector.broadcast %cst_24 : f32 to vector<128x128xf32>
    %27 = arith.maximumf %25, %26 : vector<128x128xf32>
    %c0_25 = arith.constant 0 : index
    %c0_26 = arith.constant 0 : index
    %28 = vector.load %arg5[%c0_25, %c0_26] : memref<128x128xbf16, #tpu.memory_space<vmem>>, vector<128x128xbf16>
    %29 = arith.truncf %27 : vector<128x128xf32> to vector<128x128xbf16>
    %cst_27 = arith.constant dense<0.000000e+00> : vector<128x128xf32>
    %30 = tpu.matmul %28, %29, %cst_27 {dimension_numbers = #tpu.dot_dimension_numbers<[1], [0], [0], [1], [0, 0, 1, 1], [], []>} : vector<128x128xbf16>, vector<128x128xbf16>, vector<128x128xf32> -> vector<128x128xf32>
    %31 = arith.truncf %30 : vector<128x128xf32> to vector<128x128xbf16>
    %c0_28 = arith.constant 0 : index
    %c0_29 = arith.constant 0 : index
    %32 = vector.load %arg10[%c0_28, %c0_29] : memref<128x128xbf16, #tpu.memory_space<vmem>>, vector<128x128xbf16>
    %cst_30 = arith.constant dense<0.000000e+00> : vector<128x128xf32>
    %33 = tpu.matmul %31, %32, %cst_30 {dimension_numbers = #tpu.dot_dimension_numbers<[1], [0], [0], [1], [0, 0, 1, 1], [], []>} : vector<128x128xbf16>, vector<128x128xbf16>, vector<128x128xf32> -> vector<128x128xf32>
    %c0_31 = arith.constant 0 : index
    %c0_32 = arith.constant 0 : index
    %34 = vector.load %arg11[%c0_31, %c0_32] : memref<128x128xbf16, #tpu.memory_space<vmem>>, vector<128x128xbf16>
    %cst_33 = arith.constant dense<0.000000e+00> : vector<128x128xf32>
    %35 = tpu.matmul %31, %34, %cst_33 {dimension_numbers = #tpu.dot_dimension_numbers<[1], [0], [0], [1], [0, 0, 1, 1], [], []>} : vector<128x128xbf16>, vector<128x128xbf16>, vector<128x128xf32> -> vector<128x128xf32>
    %c0_34 = arith.constant 0 : index
    %c0_35 = arith.constant 0 : index
    %36 = vector.load %arg3[%c0_34, %c0_35] : memref<128x128xbf16, #tpu.memory_space<vmem>>, vector<128x128xbf16>
    %37 = arith.truncf %33 : vector<128x128xf32> to vector<128x128xbf16>
    %cst_36 = arith.constant dense<0.000000e+00> : vector<128x128xf32>
    %38 = tpu.matmul %36, %37, %cst_36 {dimension_numbers = #tpu.dot_dimension_numbers<[1], [0], [0], [1], [0, 0, 1, 1], [], []>} : vector<128x128xbf16>, vector<128x128xbf16>, vector<128x128xf32> -> vector<128x128xf32>
    %c0_37 = arith.constant 0 : index
    %c0_38 = arith.constant 0 : index
    %39 = vector.load %arg4[%c0_37, %c0_38] : memref<128x128xbf16, #tpu.memory_space<vmem>>, vector<128x128xbf16>
    %40 = arith.truncf %35 : vector<128x128xf32> to vector<128x128xbf16>
    %cst_39 = arith.constant dense<0.000000e+00> : vector<128x128xf32>
    %41 = tpu.matmul %39, %40, %cst_39 {dimension_numbers = #tpu.dot_dimension_numbers<[1], [0], [0], [1], [0, 0, 1, 1], [], []>} : vector<128x128xbf16>, vector<128x128xbf16>, vector<128x128xf32> -> vector<128x128xf32>
    %42 = arith.addf %38, %41 : vector<128x128xf32>
    %c0_40 = arith.constant 0 : index
    %c0_41 = arith.constant 0 : index
    %43 = vector.load %arg13[%c0_40, %c0_41] : memref<128x128xf32, #tpu.memory_space<vmem>>, vector<128x128xf32>
    %44 = arith.addf %42, %43 : vector<128x128xf32>
    %cst_42 = arith.constant 0.000000e+00 : f32
    %45 = vector.broadcast %cst_42 : f32 to vector<128x128xf32>
    %46 = arith.maximumf %44, %45 : vector<128x128xf32>
    %c0_43 = arith.constant 0 : index
    %c0_44 = arith.constant 0 : index
    %47 = vector.load %arg5[%c0_43, %c0_44] : memref<128x128xbf16, #tpu.memory_space<vmem>>, vector<128x128xbf16>
    %48 = arith.truncf %46 : vector<128x128xf32> to vector<128x128xbf16>
    %cst_45 = arith.constant dense<0.000000e+00> : vector<128x128xf32>
    %49 = tpu.matmul %47, %48, %cst_45 {dimension_numbers = #tpu.dot_dimension_numbers<[1], [0], [0], [1], [0, 0, 1, 1], [], []>} : vector<128x128xbf16>, vector<128x128xbf16>, vector<128x128xf32> -> vector<128x128xf32>
    %c0_46 = arith.constant 0 : index
    %c0_47 = arith.constant 0 : index
    %c0_48 = arith.constant 0 : index
    %50 = vector.load %arg16[%c0_46, %c0_47, %c0_48] : memref<1x128x128xf32, #tpu.memory_space<vmem>>, vector<1x128x128xf32>
    %51 = vector.shape_cast %50 : vector<1x128x128xf32> to vector<128x128xf32>
    %52 = vector.shape_cast %49 : vector<128x128xf32> to vector<1x128x128xf32>
    tpu.vector_store %arg16[%c0_46, %c0_47, %c0_48], %52 {strides = array<i32>} : memref<1x128x128xf32, #tpu.memory_space<vmem>>, vector<1x128x128xf32>,
    %c0_49 = arith.constant 0 : index
    %c0_50 = arith.constant 0 : index
    %53 = vector.load %arg14[%c0_49, %c0_50] : memref<128x128xf32, #tpu.memory_space<vmem>>, vector<128x128xf32>
    %cst_51 = arith.constant dense<0.000000e+00> : vector<128x128xf32>
    %54 = tpu.matmul %3, %53, %cst_51 {dimension_numbers = #tpu.dot_dimension_numbers<[1], [0], [0], [1], [0, 0, 1, 1], [], []>} : vector<128x128xf32>, vector<128x128xf32>, vector<128x128xf32> -> vector<128x128xf32>
    %c0_52 = arith.constant 0 : index
    %c0_53 = arith.constant 0 : index
    %55 = vector.load %arg15[%c0_52, %c0_53] : memref<128x128xf32, #tpu.memory_space<vmem>>, vector<128x128xf32>
    %cst_54 = arith.constant dense<0.000000e+00> : vector<128x128xf32>
    %56 = tpu.matmul %49, %55, %cst_54 {dimension_numbers = #tpu.dot_dimension_numbers<[1], [0], [0], [1], [0, 0, 1, 1], [], []>} : vector<128x128xf32>, vector<128x128xf32>, vector<128x128xf32> -> vector<128x128xf32>
    %57 = arith.addf %54, %56 : vector<128x128xf32>
    %c0_55 = arith.constant 0 : index
    %c0_56 = arith.constant 0 : index
    %58 = vector.load %arg17[%c0_55, %c0_56] : memref<128x128xf32, #tpu.memory_space<vmem>>, vector<128x128xf32>
    tpu.vector_store %arg17[%c0_55, %c0_56], %57 {strides = array<i32>} : memref<128x128xf32, #tpu.memory_space<vmem>>, vector<128x128xf32>,
    return
  }
  func.func @transform_0(%arg0: i32) -> (i32, i32, i32) {
    %c0_i32 = arith.constant 0 : i32
    %c0_i32_0 = arith.constant 0 : i32
    %c0_i32_1 = arith.constant 0 : i32
    return %arg0, %c0_i32, %c0_i32_0 : i32, i32, i32
  }
  func.func @transform_1(%arg0: i32) -> (i32, i32) {
    %c0_i32 = arith.constant 0 : i32
    %c0_i32_0 = arith.constant 0 : i32
    %c0_i32_1 = arith.constant 0 : i32
    return %c0_i32, %c0_i32_0 : i32, i32
  }
  func.func @transform_2(%arg0: i32) -> (i32, i32) {
    %c0_i32 = arith.constant 0 : i32
    %c0_i32_0 = arith.constant 0 : i32
    %c0_i32_1 = arith.constant 0 : i32
    return %c0_i32, %c0_i32_0 : i32, i32
  }
  func.func @transform_3(%arg0: i32) -> (i32, i32) {
    %c0_i32 = arith.constant 0 : i32
    %c0_i32_0 = arith.constant 0 : i32
    %c0_i32_1 = arith.constant 0 : i32
    return %c0_i32, %c0_i32_0 : i32, i32
  }
  func.func @transform_4(%arg0: i32) -> (i32, i32) {
    %c0_i32 = arith.constant 0 : i32
    %c0_i32_0 = arith.constant 0 : i32
    %c0_i32_1 = arith.constant 0 : i32
    return %c0_i32, %c0_i32_0 : i32, i32
  }
  func.func @transform_5(%arg0: i32) -> (i32, i32) {
    %c0_i32 = arith.constant 0 : i32
    %c0_i32_0 = arith.constant 0 : i32
    %c0_i32_1 = arith.constant 0 : i32
    return %c0_i32, %c0_i32_0 : i32, i32
  }
  func.func @transform_6(%arg0: i32) -> (i32, i32) {
    %c0_i32 = arith.constant 0 : i32
    %c0_i32_0 = arith.constant 0 : i32
    %c0_i32_1 = arith.constant 0 : i32
    return %c0_i32, %c0_i32_0 : i32, i32
  }
  func.func @transform_7(%arg0: i32) -> (i32, i32) {
    %c0_i32 = arith.constant 0 : i32
    %c0_i32_0 = arith.constant 0 : i32
    %c0_i32_1 = arith.constant 0 : i32
    return %c0_i32, %c0_i32_0 : i32, i32
  }
  func.func @transform_8(%arg0: i32) -> (i32, i32) {
    %c0_i32 = arith.constant 0 : i32
    %c0_i32_0 = arith.constant 0 : i32
    %c0_i32_1 = arith.constant 0 : i32
    return %c0_i32, %c0_i32_0 : i32, i32
  }
  func.func @transform_9(%arg0: i32) -> (i32, i32) {
    %c0_i32 = arith.constant 0 : i32
    %c0_i32_0 = arith.constant 0 : i32
    %c0_i32_1 = arith.constant 0 : i32
    return %c0_i32, %c0_i32_0 : i32, i32
  }
  func.func @transform_10(%arg0: i32) -> (i32, i32) {
    %c0_i32 = arith.constant 0 : i32
    %c0_i32_0 = arith.constant 0 : i32
    %c0_i32_1 = arith.constant 0 : i32
    return %c0_i32, %c0_i32_0 : i32, i32
  }
  func.func @transform_11(%arg0: i32) -> (i32, i32) {
    %c0_i32 = arith.constant 0 : i32
    %c0_i32_0 = arith.constant 0 : i32
    %c0_i32_1 = arith.constant 0 : i32
    return %c0_i32, %c0_i32_0 : i32, i32
  }
  func.func @transform_12(%arg0: i32) -> (i32, i32) {
    %c0_i32 = arith.constant 0 : i32
    %c0_i32_0 = arith.constant 0 : i32
    %c0_i32_1 = arith.constant 0 : i32
    return %c0_i32, %c0_i32_0 : i32, i32
  }
  func.func @transform_13(%arg0: i32) -> (i32, i32) {
    %c0_i32 = arith.constant 0 : i32
    %c0_i32_0 = arith.constant 0 : i32
    %c0_i32_1 = arith.constant 0 : i32
    return %c0_i32, %c0_i32_0 : i32, i32
  }
  func.func @transform_14(%arg0: i32) -> (i32, i32) {
    %c0_i32 = arith.constant 0 : i32
    %c0_i32_0 = arith.constant 0 : i32
    %c0_i32_1 = arith.constant 0 : i32
    return %c0_i32, %c0_i32_0 : i32, i32
  }
  func.func @transform_15(%arg0: i32) -> (i32, i32, i32) {
    %c0_i32 = arith.constant 0 : i32
    %c0_i32_0 = arith.constant 0 : i32
    %c0_i32_1 = arith.constant 0 : i32
    return %arg0, %c0_i32, %c0_i32_0 : i32, i32, i32
  }
}

</mosaic_0001>

<bundles_post_ra>
// kernel: gnn_model_forward.1
= control target key start
LH: loop header
LB: loop body
LE: loop exit
PB: predicated region body
PF: predicated region fallthrough
CT: control target
= control target key end

     0   :  { %s4103_s18 = smov 0   ;;  %s4764_s0 = inlined_call_operand.vmem [shape: bf16[2,128,128], index: 0, kind: input, shape index: {}]   ;;  %s4765_s1 = inlined_call_operand.vmem [shape: f32[128,128], index: 1, kind: input, shape index: {}]   ;;  %s4766_s2 = inlined_call_operand.vmem [shape: bf16[128,128], index: 2, kind: input, shape index: {}]   ;;  %s4767_s3 = inlined_call_operand.vmem [shape: bf16[128,128], index: 3, kind: input, shape index: {}]   ;;  %s4768_s4 = inlined_call_operand.vmem [shape: bf16[128,128], index: 4, kind: input, shape index: {}]   ;;  %s4769_s5 = inlined_call_operand.vmem [shape: bf16[128,128], index: 5, kind: input, shape index: {}]   ;;  %s4770_s6 = inlined_call_operand.vmem [shape: bf16[128,128], index: 6, kind: input, shape index: {}]   ;;  %s4771_s7 = inlined_call_operand.vmem [shape: bf16[128,128], index: 7, kind: input, shape index: {}]   ;;  %s4772_s8 = inlined_call_operand.vmem [shape: bf16[128,128], index: 8, kind: input, shape index: {}]   ;;  %s4773_s9 = inlined_call_operand.vmem [shape: bf16[128,128], index: 9, kind: input, shape index: {}]   ;;  %s4774_s10 = inlined_call_operand.vmem [shape: bf16[128,128], index: 10, kind: input, shape index: {}]   ;;  %s4775_s11 = inlined_call_operand.vmem [shape: f32[128,128], index: 11, kind: input, shape index: {}]   ;;  %s4776_s12 = inlined_call_operand.vmem [shape: f32[128,128], index: 12, kind: input, shape index: {}]   ;;  %s4777_s13 = inlined_call_operand.vmem [shape: f32[128,128], index: 13, kind: input, shape index: {}]   ;;  %s4778_s14 = inlined_call_operand.vmem [shape: f32[128,128], index: 14, kind: input, shape index: {}]   ;;  %s4779_s15 = inlined_call_operand.vmem [shape: f32[2,128,128], index: 15, kind: output, shape index: {}]  }
   0x1 LB: > { %4781 = sst [smem:[#allocation3_spill]] %s4021_s18  ;;  %s2921_s19 = sadd.s32 4294967295, %s4021_s18   ;;  %s4021_s18 = sphi %s4103_s18, %s25_s18  }
   0x2   : > { %p2925_p0 = scmp.ge.s32.totalorder %s4021_s18, 1  ;;  %p437_p1 = scmp.lt.s32.totalorder %s4021_s18, 3 }
   0x4   : > { %p438_p2 = pnand %p2925_p0, %p437_p1 }
   0x5   : > { %p485_p3 = scmp.lt.s32.totalorder (!%p438_p2), %s2921_s19, 1  ;;  %p2930_p4 = scmp.ne.s32.totalorder (!%p438_p2), %s2921_s19, 0 }
   0x6   : > { %441 = sbr.rel (%p438_p2) target bundleno = 1895 (0x767), region = 80 }
   0xd   : > { %s486_s20 = scalar_select %p485_p3, %s2921_s19, 1 }
   0xe   : > { %499 = sbr.rel (%p2930_p4) target bundleno = 23 (0x17), region = 84  ;;  %v500_v0 = vld [vmem:[%s4765_s1] sm:$0xff] (!%p2930_p4)  ;;  %v501_v1 = vld [vmem:[%s4765_s1 + $0x8] sm:$0xff] (!%p2930_p4)  ;;  %v502_v2 = vld [vmem:[%s4765_s1 + $0x10] sm:$0xff] (!%p2930_p4) }
   0xf   : > { %s3013_s21 = sshll.u32 %s486_s20, 6  ;;  %s3014_s22 = sshll.u32 %s486_s20, 7  ;;  %516 = vst [vmem:[#allocation2] sm:$0xff] (!%p2930_p4), %v500_v0  ;;  %517 = vst [vmem:[#allocation2 + $0x8] sm:$0xff] (!%p2930_p4), %v501_v1  ;;  %v503_v3 = vld [vmem:[%s4765_s1 + $0x18] sm:$0xff] (!%p2930_p4)  ;;  %v504_v4 = vld [vmem:[%s4765_s1 + $0x20] sm:$0xff] (!%p2930_p4) }
  0x10   : > { %s4114_s25 = scalar_lea.vmem %s4764_s0, %s3013_s21  ;;  %s4119_s28 = scalar_lea.vmem %s4779_s15, %s3014_s22  ;;  %518 = vst [vmem:[#allocation2 + $0x10] sm:$0xff] (!%p2930_p4), %v502_v2  ;;  %v505_v5 = vld [vmem:[%s4765_s1 + $0x28] sm:$0xff] (!%p2930_p4)  ;;  %519 = vst [vmem:[#allocation2 + $0x18] sm:$0xff] (!%p2930_p4), %v503_v3  ;;  %v506_v6 = vld [vmem:[%s4765_s1 + $0x30] sm:$0xff] (!%p2930_p4) }
  0x11   : > { %520 = vst [vmem:[#allocation2 + $0x20] sm:$0xff] (!%p2930_p4), %v504_v4  ;;  %521 = vst [vmem:[#allocation2 + $0x28] sm:$0xff] (!%p2930_p4), %v505_v5  ;;  %v507_v7 = vld [vmem:[%s4765_s1 + $0x38] sm:$0xff] (!%p2930_p4)  ;;  %v508_v8 = vld [vmem:[%s4765_s1 + $0x40] sm:$0xff] (!%p2930_p4) }
  0x12   : > { %522 = vst [vmem:[#allocation2 + $0x30] sm:$0xff] (!%p2930_p4), %v506_v6  ;;  %523 = vst [vmem:[#allocation2 + $0x38] sm:$0xff] (!%p2930_p4), %v507_v7  ;;  %v509_v9 = vld [vmem:[%s4765_s1 + $0x48] sm:$0xff] (!%p2930_p4)  ;;  %v510_v10 = vld [vmem:[%s4765_s1 + $0x50] sm:$0xff] (!%p2930_p4) }
  0x13   : > { %524 = vst [vmem:[#allocation2 + $0x40] sm:$0xff] (!%p2930_p4), %v508_v8  ;;  %v511_v11 = vld [vmem:[%s4765_s1 + $0x58] sm:$0xff] (!%p2930_p4)  ;;  %525 = vst [vmem:[#allocation2 + $0x48] sm:$0xff] (!%p2930_p4), %v509_v9  ;;  %v512_v12 = vld [vmem:[%s4765_s1 + $0x60] sm:$0xff] (!%p2930_p4) }
  0x14   : > { %526 = vst [vmem:[#allocation2 + $0x50] sm:$0xff] (!%p2930_p4), %v510_v10  ;;  %527 = vst [vmem:[#allocation2 + $0x58] sm:$0xff] (!%p2930_p4), %v511_v11  ;;  %v513_v13 = vld [vmem:[%s4765_s1 + $0x68] sm:$0xff] (!%p2930_p4)  ;;  %v514_v14 = vld [vmem:[%s4765_s1 + $0x70] sm:$0xff] (!%p2930_p4) }
  0x15   : > { %528 = vst [vmem:[#allocation2 + $0x60] sm:$0xff] %v512_v12  ;;  %529 = vst [vmem:[#allocation2 + $0x68] sm:$0xff] %v513_v13  ;;  %v515_v15 = vld [vmem:[%s4765_s1 + $0x78] sm:$0xff] }
  0x16   : > { %530 = vst [vmem:[#allocation2 + $0x70] sm:$0xff] %v514_v14  ;;  %531 = vst [vmem:[#allocation2 + $0x78] sm:$0xff] %v515_v15 }
  0x17 PF: > { %v3919_v16 = vld [vmem:[%s4770_s6] sm:$0xff]   ;;  %v3921_v18 = vld [vmem:[%s4770_s6 + $0x8] sm:$0xff]   ;;  %v3923_v20 = vld [vmem:[%s4770_s6 + $0x10] sm:$0xff]  }
  0x18   : > { %v3920_v17 = vld [vmem:[%s4769_s5] sm:$0xff]   ;;  %3271 = vmatprep.subr.bf16.mxu1 %v3919_v16  ;;  %v3922_v19 = vld [vmem:[%s4769_s5 + $0x8] sm:$0xff]   ;;  %v3924_v21 = vld [vmem:[%s4769_s5 + $0x10] sm:$0xff]  }
  0x19   : > { %3303 = vmatprep.subr.bf16.mxu0 %v3920_v17  ;;  %3272 = vmatpush3.bf16.msra.mxu1 %v3919_v16  ;;  %v3925_v22 = vld [vmem:[%s4770_s6 + $0x18] sm:$0xff]   ;;  %v3927_v24 = vld [vmem:[%s4770_s6 + $0x20] sm:$0xff]   ;;  %v3929_v26 = vld [vmem:[%s4770_s6 + $0x28] sm:$0xff]  }
  0x1a   : > { %3304 = vmatpush3.bf16.msra.mxu0 %v3920_v17  ;;  %3273 = vmatprep.subr.bf16.mxu1 %v3921_v18  ;;  %v3926_v23 = vld [vmem:[%s4769_s5 + $0x18] sm:$0xff]   ;;  %v3928_v25 = vld [vmem:[%s4769_s5 + $0x20] sm:$0xff]   ;;  %v3930_v27 = vld [vmem:[%s4769_s5 + $0x28] sm:$0xff]  }
  0x1b   : > { %3305 = vmatprep.subr.bf16.mxu0 %v3922_v19  ;;  %v4206_v28 = vld [vmem:[%s4114_s25] sm:$0xff]   ;;  %v533_v30 = vld [vmem:[#allocation2 + $0x8] sm:$0xff]  ;;  %v3931_v32 = vld [vmem:[%s4770_s6 + $0x30] sm:$0xff]  }
  0x1c   : > { %v532_v29 = vld [vmem:[#allocation2] sm:$0xff]  ;;  %3287 = vmatprep.mubr.bf16.mxu1 %v4206_v28  ;;  %v3932_v33 = vld [vmem:[%s4769_s5 + $0x30] sm:$0xff]   ;;  %v3933_v34 = vld [vmem:[%s4770_s6 + $0x38] sm:$0xff]  }
  0x1d   : > { %3274 = vmatpush3.bf16.msra.mxu1 %v3921_v18  ;;  %v4209_v31 = vpack.c.bf16 %v533_v30, %v532_v29  ;;  %v3934_v35 = vld [vmem:[%s4769_s5 + $0x38] sm:$0xff]   ;;  %v534_v36 = vld [vmem:[#allocation2 + $0x10] sm:$0xff]  ;;  %v3937_v38 = vld [vmem:[%s4772_s8] sm:$0xff]  }
  0x1e   : > { %3306 = vmatpush3.bf16.msra.mxu0 %v3922_v19  ;;  %3275 = vmatprep.subr.bf16.mxu1 %v3923_v20  ;;  %v535_v37 = vld [vmem:[#allocation2 + $0x18] sm:$0xff]  ;;  %v4228_v39 = vld [vmem:[%s4114_s25 + $0x8] sm:$0xff]   ;;  %v536_v40 = vld [vmem:[#allocation2 + $0x20] sm:$0xff] }
  0x1f   : > { %3307 = vmatprep.subr.bf16.mxu0 %v3924_v21  ;;  %3319 = vmatprep.mubr.bf16.mxu0 %v4209_v31  ;;  %v537_v41 = vld [vmem:[#allocation2 + $0x28] sm:$0xff]  ;;  %v4230_v42 = vpack.c.bf16 %v535_v37, %v534_v36  ;;  %v4236_v44 = vld [vmem:[%s4114_s25 + $0x10] sm:$0xff]   ;;  %v539_v47 = vld [vmem:[#allocation2 + $0x38] sm:$0xff] }
  0x20   : > { %v3938_v43 = vld [vmem:[%s4772_s8 + $0x8] sm:$0xff]   ;;  %v4238_v45 = vpack.c.bf16 %v537_v41, %v536_v40  ;;  %v538_v46 = vld [vmem:[#allocation2 + $0x30] sm:$0xff]  ;;  %v3940_v48 = vld [vmem:[%s4114_s25 + $0x18] sm:$0xff]  }
  0x21   : > { %3276 = vmatpush3.bf16.msra.mxu1 %v3923_v20  ;;  %v3941_v49 = vld [vmem:[%s4772_s8 + $0x10] sm:$0xff]   ;;  %v540_v50 = vld [vmem:[#allocation2 + $0x40] sm:$0xff]  ;;  %v541_v51 = vld [vmem:[#allocation2 + $0x48] sm:$0xff]  ;;  %v4248_v52 = vpack.c.bf16 %v539_v47, %v538_v46 }
  0x22   : > { %3308 = vmatpush3.bf16.msra.mxu0 %v3924_v21  ;;  %3277 = vmatprep.subr.bf16.mxu1 %v3925_v22  ;;  %v3942_v53 = vld [vmem:[%s4772_s8 + $0x18] sm:$0xff]   ;;  %v3943_v54 = vld [vmem:[%s4114_s25 + $0x20] sm:$0xff]   ;;  %v4254_v55 = vpack.c.bf16 %v541_v51, %v540_v50  ;;  %v542_v56 = vld [vmem:[#allocation2 + $0x50] sm:$0xff] }
  0x23   : > { %3309 = vmatprep.subr.bf16.mxu0 %v3926_v23  ;;  %v543_v57 = vld [vmem:[#allocation2 + $0x58] sm:$0xff]  ;;  %v3945_v58 = vld [vmem:[%s4772_s8 + $0x20] sm:$0xff]   ;;  %v3944_v59 = vld [vmem:[%s4114_s25 + $0x28] sm:$0xff]  }
  0x24   : > { %v544_v60 = vld [vmem:[#allocation2 + $0x60] sm:$0xff]  ;;  %v545_v61 = vld [vmem:[#allocation2 + $0x68] sm:$0xff]  ;;  %v3947_v63 = vld [vmem:[%s4114_s25 + $0x30] sm:$0xff]   ;;  %v553_v0 = vpack.c.bf16 %v543_v57, %v542_v56 }
  0x25   : > { %3278 = vmatpush3.bf16.msra.mxu1 %v3925_v22  ;;  %v3946_v62 = vld [vmem:[%s4772_s8 + $0x28] sm:$0xff]   ;;  %v554_v1 = vpack.c.bf16 %v545_v61, %v544_v60  ;;  %v546_v2 = vld [vmem:[#allocation2 + $0x70] sm:$0xff]  ;;  %v547_v3 = vld [vmem:[#allocation2 + $0x78] sm:$0xff] }
  0x26   : > { %3310 = vmatpush3.bf16.msra.mxu0 %v3926_v23  ;;  %3279 = vmatprep.subr.bf16.mxu1 %v3927_v24  ;;  %v3949_v4 = vld [vmem:[%s4772_s8 + $0x30] sm:$0xff]   ;;  %v3948_v5 = vld [vmem:[%s4114_s25 + $0x38] sm:$0xff]   ;;  %v555_v7 = vpack.c.bf16 %v547_v3, %v546_v2  ;;  %v3951_v8 = vld [vmem:[%s4771_s7] sm:$0xff]  }
  0x27   : > { %3311 = vmatprep.subr.bf16.mxu0 %v3928_v25  ;;  %v3950_v6 = vld [vmem:[%s4772_s8 + $0x38] sm:$0xff]   ;;  %v3952_v9 = vld [vmem:[%s4771_s7 + $0x8] sm:$0xff]   ;;  %v3953_v10 = vld [vmem:[%s4771_s7 + $0x10] sm:$0xff]  }
  0x28   : > { %v3954_v11 = vld [vmem:[%s4771_s7 + $0x18] sm:$0xff]   ;;  %v3955_v12 = vld [vmem:[%s4771_s7 + $0x20] sm:$0xff]   ;;  %v3956_v13 = vld [vmem:[%s4771_s7 + $0x28] sm:$0xff]  }
  0x29   : > { %3280 = vmatpush3.bf16.msra.mxu1 %v3927_v24  ;;  %v3957_v14 = vld [vmem:[%s4771_s7 + $0x30] sm:$0xff]   ;;  %v3958_v15 = vld [vmem:[%s4771_s7 + $0x38] sm:$0xff]   ;;  %v4308_v16 = vld [vmem:[%s4767_s3] sm:$0xff]  }
  0x2a   : > { %3312 = vmatpush3.bf16.msra.mxu0 %v3928_v25  ;;  %3281 = vmatprep.subr.bf16.mxu1 %v3929_v26 }
  0x2b   : > { %3313 = vmatprep.subr.bf16.mxu0 %v3930_v27 }
  0x2d   : > { %3282 = vmatpush3.bf16.msra.mxu1 %v3929_v26 }
  0x2e   : > { %3314 = vmatpush3.bf16.msra.mxu0 %v3930_v27  ;;  %3283 = vmatprep.subr.bf16.mxu1 %v3931_v32 }
  0x2f   : > { %3315 = vmatprep.subr.bf16.mxu0 %v3932_v33 }
  0x31   : > { %3284 = vmatpush3.bf16.msra.mxu1 %v3931_v32 }
  0x32   : > { %3316 = vmatpush3.bf16.msra.mxu0 %v3932_v33  ;;  %3285 = vmatprep.subr.bf16.mxu1 %v3933_v34 }
  0x33   : > { %3317 = vmatprep.subr.bf16.mxu0 %v3934_v35 }
  0x35   : > { %3286 = vmatpush3.bf16.msra.mxu1 %v3933_v34 }
  0x36   : > { %3318 = vmatpush3.bf16.msra.mxu0 %v3934_v35  ;;  %3335 = vmatprep.subr.bf16.mxu1 %v3937_v38 }
  0x38   : > { %3288 = vmatmul.mubr.bf16.vlgmr.msra.gmra.mrb[0].mxu1 %v4228_v39 }
  0x39   : > { %3320 = vmatmul.mubr.bf16.vlgmr.msra.gmra.mrb[0].mxu0 %v4230_v42  ;;  %3336 = vmatpush3.bf16.msra.mxu1 %v3937_v38 }
  0x3a   : > { %3337 = vmatprep.subr.bf16.mxu1 %v3938_v43  ;;  %3291 = vmatprep.mubr.bf16.mxu1 %v4236_v44 }
  0x3b   : > { %3323 = vmatprep.mubr.bf16.mxu0 %v4238_v45 }
  0x3d   : > { %3338 = vmatpush3.bf16.msra.mxu1 %v3938_v43 }
  0x3e   : > { %3339 = vmatprep.subr.bf16.mxu1 %v3941_v49 }
  0x40   : > { %3292 = vmatmul.mubr.bf16.gmra.mrb[4].mxu1 %v3940_v48 }
  0x41   : > { %3324 = vmatmul.mubr.bf16.gmra.mrb[4].mxu0 %v4248_v52  ;;  %3340 = vmatpush3.bf16.msra.mxu1 %v3941_v49 }
  0x42   : > { %3341 = vmatprep.subr.bf16.mxu1 %v3942_v53  ;;  %3295 = vmatprep.mubr.bf16.mxu1 %v3943_v54 }
  0x43   : > { %3327 = vmatprep.mubr.bf16.mxu0 %v4254_v55 }
  0x45   : > { %3342 = vmatpush3.bf16.msra.mxu1 %v3942_v53 }
  0x46   : > { %3343 = vmatprep.subr.bf16.mxu1 %v3945_v58 }
  0x48   : > { %3296 = vmatmul.mubr.bf16.gmra.mrb[8].mxu1 %v3944_v59 }
  0x49   : > { %3328 = vmatmul.mubr.bf16.gmra.mrb[8].mxu0 %v553_v0  ;;  %3344 = vmatpush3.bf16.msra.mxu1 %v3945_v58 }
  0x4a   : > { %3345 = vmatprep.subr.bf16.mxu1 %v3946_v62  ;;  %3299 = vmatprep.mubr.bf16.mxu1 %v3947_v63 }
  0x4b   : > { %3331 = vmatprep.mubr.bf16.mxu0 %v554_v1 }
  0x4d   : > { %3346 = vmatpush3.bf16.msra.mxu1 %v3946_v62 }
  0x4e   : > { %3347 = vmatprep.subr.bf16.mxu1 %v3949_v4 }
  0x50   : > { %3300 = vmatmul.mubr.bf16.gmra.mrb[12].mxu1 %v3948_v5 }
  0x51   : > { %3332 = vmatmul.mubr.bf16.gmra.mrb[12].mxu0 %v555_v7  ;;  %3348 = vmatpush3.bf16.msra.mxu1 %v3949_v4 }
  0x52   : > { %3349 = vmatprep.subr.bf16.mxu1 %v3950_v6  ;;  %3351 = vmatprep.mubr.bf16.mxu1 %v4206_v28 }
  0x53   : > { %3415 = vmatprep.mubr.bf16.mxu0 %v4308_v16 }
  0x55   : > { %3350 = vmatpush3.bf16.msra.mxu1 %v3950_v6 }
  0x56   : > { %3367 = vmatprep.subr.bf16.mxu1 %v3951_v8 }
  0x58   : > { %3352 = vmatmul.mubr.bf16.vlgmr.msra.gmra.mrb[16].mxu1 %v4228_v39 }
  0x59   : > { %3368 = vmatpush3.bf16.msra.mxu1 %v3951_v8  ;;  %3355 = vmatprep.mubr.bf16.mxu1 %v4236_v44 }
  0x5a   : > { %3369 = vmatprep.subr.bf16.mxu1 %v3952_v9 }
  0x5d   : > { %3370 = vmatpush3.bf16.msra.mxu1 %v3952_v9 }
  0x5e   : > { %3371 = vmatprep.subr.bf16.mxu1 %v3953_v10 }
  0x60   : > { %3356 = vmatmul.mubr.bf16.gmra.mrb[20].mxu1 %v3940_v48 }
  0x61   : > { %3372 = vmatpush3.bf16.msra.mxu1 %v3953_v10  ;;  %3359 = vmatprep.mubr.bf16.mxu1 %v3943_v54 }
  0x62   : > { %3373 = vmatprep.subr.bf16.mxu1 %v3954_v11 }
  0x65   : > { %3374 = vmatpush3.bf16.msra.mxu1 %v3954_v11 }
  0x66   : > { %3375 = vmatprep.subr.bf16.mxu1 %v3955_v12 }
  0x68   : > { %3360 = vmatmul.mubr.bf16.gmra.mrb[24].mxu1 %v3944_v59 }
  0x69   : > { %3376 = vmatpush3.bf16.msra.mxu1 %v3955_v12  ;;  %3363 = vmatprep.mubr.bf16.mxu1 %v3947_v63 }
  0x6a   : > { %3377 = vmatprep.subr.bf16.mxu1 %v3956_v13 }
  0x6d   : > { %3378 = vmatpush3.bf16.msra.mxu1 %v3956_v13 }
  0x6e   : > { %3379 = vmatprep.subr.bf16.mxu1 %v3957_v14 }
  0x70   : > { %3364 = vmatmul.mubr.bf16.gmra.mrb[28].mxu1 %v3948_v5 }
  0x71   : > { %3380 = vmatpush3.bf16.msra.mxu1 %v3957_v14  ;;  %3383 = vmatprep.mubr.bf16.mxu1 %v4209_v31 }
  0x72   : > { %3381 = vmatprep.subr.bf16.mxu1 %v3958_v15 }
  0x75   : > { %3382 = vmatpush3.bf16.msra.mxu1 %v3958_v15 }
  0x78   : > { %3384 = vmatmul.mubr.bf16.vlgmr.msra.gmra.mrb[16].mxu1 %v4230_v42 }
  0x79   : > { %3387 = vmatprep.mubr.bf16.mxu1 %v4238_v45 }
  0x80   : > { %3388 = vmatmul.mubr.bf16.gmra.mrb[20].mxu1 %v4248_v52 }
  0x81   : > { %3391 = vmatprep.mubr.bf16.mxu1 %v4254_v55 }
  0x88   : > { %3392 = vmatmul.mubr.bf16.gmra.mrb[24].mxu1 %v553_v0 }
  0x89   : > { %3395 = vmatprep.mubr.bf16.mxu1 %v554_v1 }
  0x90   : > { %3396 = vmatmul.mubr.bf16.gmra.mrb[28].mxu1 %v555_v7 }
 0x10b   : > { %v3289_v17 = vpop.f32.mrb[0].mxu1 }
 0x10c   : > { %v3321_v18 = vpop.f32.mrb[0].mxu0  ;;  %v734_v19 = vpop.f32.mrb[1].mxu1 }
 0x10d   : > { %v888_v20 = vadd.f32 %v3321_v18, %v3289_v17  ;;  %v879_v21 = vpop.f32.mrb[1].mxu0  ;;  %v3290_v22 = vpop.f32.mrb[2].mxu1 }
 0x10e   : > { %v880_v23 = vadd.f32 %v879_v21, %v734_v19  ;;  %v3322_v24 = vpop.f32.mrb[2].mxu0  ;;  %v737_v25 = vpop.f32.mrb[3].mxu1 }
 0x10f   : > { %v891_v26 = vadd.f32 %v3322_v24, %v3290_v22  ;;  %v882_v27 = vpop.f32.mrb[3].mxu0 }
 0x110   : > { %v883_v28 = vadd.f32 %v882_v27, %v737_v25 }
 0x111   : > { %v4311_v29 = vpack.c.bf16 %v891_v26, %v888_v20 }
 0x112   : > { %v4313_v30 = vpack.c.bf16 %v883_v28, %v880_v23 }
 0x113   : > { %v3293_v31 = vpop.f32.mrb[4].mxu1 }
 0x114   : > { %v3325_v32 = vpop.f32.mrb[4].mxu0  ;;  %v750_v33 = vpop.f32.mrb[5].mxu1 }
 0x115   : > { %v904_v34 = vadd.f32 %v3325_v32, %v3293_v31  ;;  %v895_v35 = vpop.f32.mrb[5].mxu0  ;;  %v3294_v36 = vpop.f32.mrb[6].mxu1 }
 0x116   : > { %v896_v37 = vadd.f32 %v895_v35, %v750_v33  ;;  %v3326_v38 = vpop.f32.mrb[6].mxu0  ;;  %v753_v39 = vpop.f32.mrb[7].mxu1 }
 0x117   : > { %v907_v40 = vadd.f32 %v3326_v38, %v3294_v36  ;;  %v898_v41 = vpop.f32.mrb[7].mxu0  ;;  %v4330_v36 = vld [vmem:[%s4767_s3 + $0x8] sm:$0xff]   ;;  %v4345_v38 = vld [vmem:[%s4767_s3 + $0x18] sm:$0xff]  }
 0x118   : > { %v899_v42 = vadd.f32 %v898_v41, %v753_v39  ;;  %v4351_v39 = vld [vmem:[%s4767_s3 + $0x20] sm:$0xff]  }
 0x119   : > { %v4315_v43 = vpack.c.bf16 %v907_v40, %v904_v34  ;;  %v4377_v40 = vld [vmem:[%s4767_s3 + $0x38] sm:$0xff]   ;;  %v4383_v41 = vld [vmem:[%s4766_s2] sm:$0xff]  }
 0x11a   : > { %v4317_v44 = vpack.c.bf16 %v899_v42, %v896_v37  ;;  %v4335_v37 = vld [vmem:[%s4767_s3 + $0x10] sm:$0xff]   ;;  %v4393_v42 = vld [vmem:[%s4766_s2 + $0x8] sm:$0xff]  }
 0x11b   : > { %v3297_v45 = vpop.f32.mrb[8].mxu1 }
 0x11c   : > { %v3329_v46 = vpop.f32.mrb[8].mxu0  ;;  %v766_v47 = vpop.f32.mrb[9].mxu1 }
 0x11d   : > { %v920_v48 = vadd.f32 %v3329_v46, %v3297_v45  ;;  %v911_v49 = vpop.f32.mrb[9].mxu0  ;;  %v3298_v50 = vpop.f32.mrb[10].mxu1  ;;  %v4411_v45 = vld [vmem:[%s4766_s2 + $0x20] sm:$0xff]   ;;  %v4418_v46 = vld [vmem:[%s4766_s2 + $0x28] sm:$0xff]  }
 0x11e   : > { %v912_v51 = vadd.f32 %v911_v49, %v766_v47  ;;  %v3330_v52 = vpop.f32.mrb[10].mxu0  ;;  %v769_v53 = vpop.f32.mrb[11].mxu1  ;;  %v4423_v47 = vld [vmem:[%s4766_s2 + $0x30] sm:$0xff]   ;;  %v4436_v49 = vld [vmem:[%s4768_s4] sm:$0xff]  }
 0x11f   : > { %v923_v54 = vadd.f32 %v3330_v52, %v3298_v50  ;;  %v914_v55 = vpop.f32.mrb[11].mxu0  ;;  %3479 = vmatprep.mubr.bf16.mxu1 %v4436_v49  ;;  %v3984_v50 = vld [vmem:[%s4774_s10] sm:$0xff]   ;;  %v3988_v52 = vld [vmem:[%s4774_s10 + $0x10] sm:$0xff]  }
 0x120   : > { %v915_v56 = vadd.f32 %v914_v55, %v769_v53  ;;  %v3990_v53 = vld [vmem:[%s4774_s10 + $0x18] sm:$0xff]   ;;  %v3994_v55 = vld [vmem:[%s4774_s10 + $0x28] sm:$0xff]  }
 0x121   : > { %v4319_v57 = vpack.c.bf16 %v923_v54, %v920_v48  ;;  %v4430_v48 = vld [vmem:[%s4766_s2 + $0x38] sm:$0xff]   ;;  %v3992_v54 = vld [vmem:[%s4774_s10 + $0x20] sm:$0xff]  }
 0x122   : > { %v4321_v58 = vpack.c.bf16 %v915_v56, %v912_v51  ;;  %v3986_v51 = vld [vmem:[%s4774_s10 + $0x8] sm:$0xff]   ;;  %v3996_v56 = vld [vmem:[%s4774_s10 + $0x30] sm:$0xff]  }
 0x123   : > { %v3301_v59 = vpop.f32.mrb[12].mxu1 }
 0x124   : > { %v3333_v60 = vpop.f32.mrb[12].mxu0  ;;  %v782_v61 = vpop.f32.mrb[13].mxu1 }
 0x125   : > { %v936_v62 = vadd.f32 %v3333_v60, %v3301_v59  ;;  %v927_v63 = vpop.f32.mrb[13].mxu0  ;;  %v3302_v0 = vpop.f32.mrb[14].mxu1  ;;  %v1605_v60 = vld [vmem:[%s4775_s11 + $0x18] sm:$0xff] }
 0x126   : > { %v928_v1 = vadd.f32 %v927_v63, %v782_v61  ;;  %v3334_v2 = vpop.f32.mrb[14].mxu0  ;;  %v785_v3 = vpop.f32.mrb[15].mxu1  ;;  %v1603_v63 = vld [vmem:[%s4775_s11 + $0x8] sm:$0xff] }
 0x127   : > { %v939_v4 = vadd.f32 %v3334_v2, %v3302_v0  ;;  %v930_v5 = vpop.f32.mrb[15].mxu0 }
 0x128   : > { %v931_v6 = vadd.f32 %v930_v5, %v785_v3 }
 0x129   : > { %v4323_v7 = vpack.c.bf16 %v939_v4, %v936_v62 }
 0x12a   : > { %v4325_v8 = vpack.c.bf16 %v931_v6, %v928_v1 }
 0x14b   : > { %v3385_v9 = vpop.f32.mrb[16].mxu1 }
 0x14c   : > { %v1201_v10 = vpop.f32.mrb[17].mxu1 }
 0x14d   : > { %v3386_v11 = vpop.f32.mrb[18].mxu1 }
 0x14e   : > { %v1305_v12 = vpack.c.bf16 %v3386_v11, %v3385_v9  ;;  %v1204_v13 = vpop.f32.mrb[19].mxu1  ;;  %v1608_v9 = vld [vmem:[%s4775_s11 + $0x30] sm:$0xff]  ;;  %v1606_v11 = vld [vmem:[%s4775_s11 + $0x20] sm:$0xff] }
 0x14f   : > { %v1304_v14 = vpack.c.bf16 %v1204_v13, %v1201_v10 }
 0x151   : > { %3399 = vmatprep.subr.bf16.mxu0 %v1304_v14 }
 0x152   : > { %3400 = vmatpush3.bf16.msra.mxu0 %v1304_v14  ;;  %v1609_v14 = vld [vmem:[%s4775_s11 + $0x38] sm:$0xff] }
 0x153   : > { %v3389_v15 = vpop.f32.mrb[20].mxu1  ;;  %3401 = vmatprep.subr.bf16.mxu0 %v1305_v12 }
 0x154   : > { %v1217_v17 = vpop.f32.mrb[21].mxu1 }
 0x155   : > { %v3390_v18 = vpop.f32.mrb[22].mxu1 }
 0x156   : > { %v1307_v19 = vpack.c.bf16 %v3390_v18, %v3389_v15  ;;  %v1220_v20 = vpop.f32.mrb[23].mxu1  ;;  %3402 = vmatpush3.bf16.msra.mxu0 %v1305_v12  ;;  %v1607_v18 = vld [vmem:[%s4775_s11 + $0x28] sm:$0xff] }
 0x157   : > { %v1306_v21 = vpack.c.bf16 %v1220_v20, %v1217_v17 }
 0x159   : > { %3403 = vmatprep.subr.bf16.mxu0 %v1306_v21 }
 0x15a   : > { %3404 = vmatpush3.bf16.msra.mxu0 %v1306_v21 }
 0x15b   : > { %v3393_v22 = vpop.f32.mrb[24].mxu1  ;;  %3405 = vmatprep.subr.bf16.mxu0 %v1307_v19 }
 0x15c   : > { %v1233_v23 = vpop.f32.mrb[25].mxu1 }
 0x15d   : > { %v3394_v24 = vpop.f32.mrb[26].mxu1 }
 0x15e   : > { %v1309_v25 = vpack.c.bf16 %v3394_v24, %v3393_v22  ;;  %v1236_v26 = vpop.f32.mrb[27].mxu1  ;;  %3406 = vmatpush3.bf16.msra.mxu0 %v1307_v19 }
 0x15f   : > { %v1308_v27 = vpack.c.bf16 %v1236_v26, %v1233_v23 }
 0x161   : > { %3407 = vmatprep.subr.bf16.mxu0 %v1308_v27 }
 0x162   : > { %3408 = vmatpush3.bf16.msra.mxu0 %v1308_v27 }
 0x163   : > { %v3397_v28 = vpop.f32.mrb[28].mxu1  ;;  %3409 = vmatprep.subr.bf16.mxu0 %v1309_v25 }
 0x164   : > { %v1249_v31 = vpop.f32.mrb[29].mxu1 }
 0x165   : > { %v3398_v32 = vpop.f32.mrb[30].mxu1 }
 0x166   : > { %v1311_v33 = vpack.c.bf16 %v3398_v32, %v3397_v28  ;;  %v1252_v34 = vpop.f32.mrb[31].mxu1  ;;  %3410 = vmatpush3.bf16.msra.mxu0 %v1309_v25  ;;  %v1612_v28 = vld [vmem:[%s4775_s11 + $0x50] sm:$0xff]  ;;  %v1610_v32 = vld [vmem:[%s4775_s11 + $0x40] sm:$0xff] }
 0x167   : > { %v1310_v35 = vpack.c.bf16 %v1252_v34, %v1249_v31 }
 0x169   : > { %3411 = vmatprep.subr.bf16.mxu0 %v1310_v35 }
 0x16a   : > { %3412 = vmatpush3.bf16.msra.mxu0 %v1310_v35  ;;  %v1613_v35 = vld [vmem:[%s4775_s11 + $0x58] sm:$0xff] }
 0x16b   : > { %3413 = vmatprep.subr.bf16.mxu0 %v1311_v33 }
 0x16e   : > { %3414 = vmatpush3.bf16.msra.mxu0 %v1311_v33 }
 0x16f   : > { %3431 = vmatprep.subr.bf16.mxu0 %v4313_v30 }
 0x171   : > { %3416 = vmatmul.mubr.bf16.vlgmr.msra.gmra.mrb[16].mxu0 %v4330_v36 }
 0x172   : > { %3432 = vmatpush3.bf16.msra.mxu0 %v4313_v30  ;;  %3419 = vmatprep.mubr.bf16.mxu0 %v4335_v37  ;;  %v4361_v30 = vld [vmem:[%s4767_s3 + $0x28] sm:$0xff]  }
 0x173   : > { %3433 = vmatprep.subr.bf16.mxu0 %v4311_v29 }
 0x176   : > { %3434 = vmatpush3.bf16.msra.mxu0 %v4311_v29  ;;  %v4367_v29 = vld [vmem:[%s4767_s3 + $0x30] sm:$0xff]  }
 0x177   : > { %3435 = vmatprep.subr.bf16.mxu0 %v4317_v44 }
 0x179   : > { %3420 = vmatmul.mubr.bf16.gmra.mrb[20].mxu0 %v4345_v38 }
 0x17a   : > { %3436 = vmatpush3.bf16.msra.mxu0 %v4317_v44  ;;  %3423 = vmatprep.mubr.bf16.mxu0 %v4351_v39  ;;  %v4406_v44 = vld [vmem:[%s4766_s2 + $0x18] sm:$0xff]  }
 0x17b   : > { %3437 = vmatprep.subr.bf16.mxu0 %v4315_v43 }
 0x17e   : > { %3438 = vmatpush3.bf16.msra.mxu0 %v4315_v43  ;;  %v4399_v43 = vld [vmem:[%s4766_s2 + $0x10] sm:$0xff]  }
 0x17f   : > { %3439 = vmatprep.subr.bf16.mxu0 %v4321_v58 }
 0x181   : > { %3424 = vmatmul.mubr.bf16.gmra.mrb[24].mxu0 %v4361_v30 }
 0x182   : > { %3440 = vmatpush3.bf16.msra.mxu0 %v4321_v58  ;;  %3427 = vmatprep.mubr.bf16.mxu0 %v4367_v29  ;;  %v1602_v58 = vld [vmem:[%s4775_s11] sm:$0xff] }
 0x183   : > { %3441 = vmatprep.subr.bf16.mxu0 %v4319_v57 }
 0x186   : > { %3442 = vmatpush3.bf16.msra.mxu0 %v4319_v57  ;;  %v1604_v57 = vld [vmem:[%s4775_s11 + $0x10] sm:$0xff] }
 0x187   : > { %3443 = vmatprep.subr.bf16.mxu0 %v4325_v8 }
 0x189   : > { %3428 = vmatmul.mubr.bf16.gmra.mrb[28].mxu0 %v4377_v40 }
 0x18a   : > { %3444 = vmatpush3.bf16.msra.mxu0 %v4325_v8  ;;  %3447 = vmatprep.mubr.bf16.mxu0 %v4383_v41 }
 0x18b   : > { %3445 = vmatprep.subr.bf16.mxu0 %v4323_v7 }
 0x18e   : > { %3446 = vmatpush3.bf16.msra.mxu0 %v4323_v7 }
 0x18f   : > { %3527 = vmatprep.subr.bf16.mxu0 %v3984_v50 }
 0x191   : > { %3448 = vmatmul.mubr.bf16.vlgmr.msra.gmra.mrb[16].mxu0 %v4393_v42 }
 0x192   : > { %3451 = vmatprep.mubr.bf16.mxu0 %v4399_v43  ;;  %3528 = vmatpush3.bf16.msra.mxu0 %v3984_v50 }
 0x193   : > { %3529 = vmatprep.subr.bf16.mxu0 %v3986_v51 }
 0x196   : > { %3530 = vmatpush3.bf16.msra.mxu0 %v3986_v51 }
 0x197   : > { %3531 = vmatprep.subr.bf16.mxu0 %v3988_v52 }
 0x199   : > { %3452 = vmatmul.mubr.bf16.gmra.mrb[20].mxu0 %v4406_v44 }
 0x19a   : > { %3455 = vmatprep.mubr.bf16.mxu0 %v4411_v45  ;;  %3532 = vmatpush3.bf16.msra.mxu0 %v3988_v52  ;;  %v1611_v52 = vld [vmem:[%s4775_s11 + $0x48] sm:$0xff] }
 0x19b   : > { %3533 = vmatprep.subr.bf16.mxu0 %v3990_v53 }
 0x19e   : > { %3534 = vmatpush3.bf16.msra.mxu0 %v3990_v53 }
 0x19f   : > { %3535 = vmatprep.subr.bf16.mxu0 %v3992_v54 }
 0x1a1   : > { %3456 = vmatmul.mubr.bf16.gmra.mrb[24].mxu0 %v4418_v46 }
 0x1a2   : > { %3459 = vmatprep.mubr.bf16.mxu0 %v4423_v47  ;;  %3536 = vmatpush3.bf16.msra.mxu0 %v3992_v54 }
 0x1a3   : > { %3537 = vmatprep.subr.bf16.mxu0 %v3994_v55 }
 0x1a6   : > { %3538 = vmatpush3.bf16.msra.mxu0 %v3994_v55 }
 0x1a7   : > { %3539 = vmatprep.subr.bf16.mxu0 %v3996_v56 }
 0x1a9   : > { %3460 = vmatmul.mubr.bf16.gmra.mrb[28].mxu0 %v4430_v48 }
 0x1aa   : > { %3540 = vmatpush3.bf16.msra.mxu0 %v3996_v56 }
 0x264   : > { %v3449_v59 = vpop.f32.mrb[16].mxu0 }
 0x265   : > { %v1620_v61 = vadd.f32 %v3449_v59, %v1604_v57  ;;  %v1539_v62 = vpop.f32.mrb[17].mxu0 }
 0x266   : > { %v1618_v0 = vadd.f32 %v1602_v58, %v1539_v62  ;;  %v3450_v1 = vpop.f32.mrb[18].mxu0  ;;  %v1616_v62 = vld [vmem:[%s4775_s11 + $0x70] sm:$0xff] }
 0x267   : > { %v1621_v2 = vadd.f32 %v3450_v1, %v1605_v60  ;;  %v1542_v3 = vpop.f32.mrb[19].mxu0  ;;  %v1636_v5 = vmax.f32 %v1620_v61, 0.0 }
 0x268   : > { %v1619_v4 = vadd.f32 %v1603_v63, %v1542_v3  ;;  %v1634_v7 = vmax.f32 %v1618_v0, 0.0  ;;  %v1614_v0 = vld [vmem:[%s4775_s11 + $0x60] sm:$0xff]  ;;  %v1617_v3 = vld [vmem:[%s4775_s11 + $0x78] sm:$0xff] }
 0x269   : > { %v1637_v6 = vmax.f32 %v1621_v2, 0.0 }
 0x26a   : > { %v1635_v8 = vmax.f32 %v1619_v4, 0.0 }
 0x26b   : > { %v1667_v10 = vpack.c.bf16 %v1637_v6, %v1636_v5  ;;  %v1615_v6 = vld [vmem:[%s4775_s11 + $0x68] sm:$0xff] }
 0x26c   : > { %v1666_v12 = vpack.c.bf16 %v1635_v8, %v1634_v7  ;;  %v3453_v13 = vpop.f32.mrb[20].mxu0 }
 0x26d   : > { %v1624_v15 = vadd.f32 %v3453_v13, %v1608_v9  ;;  %v1555_v17 = vpop.f32.mrb[21].mxu0 }
 0x26e   : > { %v1622_v19 = vadd.f32 %v1606_v11, %v1555_v17  ;;  %v3454_v20 = vpop.f32.mrb[22].mxu0  ;;  %3463 = vmatprep.subr.bf16.mxu1 %v1666_v12 }
 0x26f   : > { %v1625_v21 = vadd.f32 %v3454_v20, %v1609_v14  ;;  %v1558_v22 = vpop.f32.mrb[23].mxu0  ;;  %3464 = vmatpush3.bf16.msra.mxu1 %v1666_v12  ;;  %v1640_v24 = vmax.f32 %v1624_v15, 0.0  ;;  %v4514_v20 = vld [vmem:[%s4768_s4 + $0x8] sm:$0xff]  }
 0x270   : > { %v1623_v23 = vadd.f32 %v1607_v18, %v1558_v22  ;;  %3465 = vmatprep.subr.bf16.mxu1 %v1667_v10  ;;  %v1638_v26 = vmax.f32 %v1622_v19, 0.0  ;;  %v3983_v19 = vld [vmem:[%s4773_s9] sm:$0xff]   ;;  %v3985_v22 = vld [vmem:[%s4773_s9 + $0x8] sm:$0xff]  }
 0x271   : > { %v1641_v25 = vmax.f32 %v1625_v21, 0.0  ;;  %v4519_v21 = vld [vmem:[%s4768_s4 + $0x10] sm:$0xff]  }
 0x272   : > { %v1639_v27 = vmax.f32 %v1623_v23, 0.0  ;;  %v3987_v23 = vld [vmem:[%s4773_s9 + $0x10] sm:$0xff]  }
 0x273   : > { %v1669_v31 = vpack.c.bf16 %v1641_v25, %v1640_v24  ;;  %3466 = vmatpush3.bf16.msra.mxu1 %v1667_v10  ;;  %v4532_v24 = vld [vmem:[%s4768_s4 + $0x18] sm:$0xff]   ;;  %v4537_v25 = vld [vmem:[%s4768_s4 + $0x20] sm:$0xff]  }
 0x274   : > { %v1668_v33 = vpack.c.bf16 %v1639_v27, %v1638_v26  ;;  %v3457_v34 = vpop.f32.mrb[24].mxu0  ;;  %v3989_v26 = vld [vmem:[%s4773_s9 + $0x18] sm:$0xff]   ;;  %v3991_v27 = vld [vmem:[%s4773_s9 + $0x20] sm:$0xff]  }
 0x275   : > { %v1628_v50 = vadd.f32 %v3457_v34, %v1612_v28  ;;  %v1571_v51 = vpop.f32.mrb[25].mxu0  ;;  %v4550_v28 = vld [vmem:[%s4768_s4 + $0x28] sm:$0xff]   ;;  %v4568_v34 = vld [vmem:[%s4768_s4 + $0x38] sm:$0xff]  }
 0x276   : > { %v1626_v53 = vadd.f32 %v1610_v32, %v1571_v51  ;;  %v3458_v54 = vpop.f32.mrb[26].mxu0  ;;  %3467 = vmatprep.subr.bf16.mxu1 %v1668_v33  ;;  %v3993_v32 = vld [vmem:[%s4773_s9 + $0x28] sm:$0xff]  }
 0x277   : > { %v1629_v55 = vadd.f32 %v3458_v54, %v1613_v35  ;;  %v1574_v56 = vpop.f32.mrb[27].mxu0  ;;  %3468 = vmatpush3.bf16.msra.mxu1 %v1668_v33  ;;  %v1644_v58 = vmax.f32 %v1628_v50, 0.0  ;;  %v3995_v33 = vld [vmem:[%s4773_s9 + $0x30] sm:$0xff]   ;;  %v3997_v35 = vld [vmem:[%s4773_s9 + $0x38] sm:$0xff]  }
 0x278   : > { %v1627_v57 = vadd.f32 %v1611_v52, %v1574_v56  ;;  %3469 = vmatprep.subr.bf16.mxu1 %v1669_v31  ;;  %v1642_v60 = vmax.f32 %v1626_v53, 0.0  ;;  %v3998_v50 = vld [vmem:[%s4774_s10 + $0x38] sm:$0xff]  }
 0x279   : > { %v1645_v59 = vmax.f32 %v1629_v55, 0.0  ;;  %3541 = vmatprep.subr.bf16.mxu0 %v3998_v50 }
 0x27a   : > { %v1643_v61 = vmax.f32 %v1627_v57, 0.0  ;;  %3542 = vmatpush3.bf16.msra.mxu0 %v3998_v50 }
 0x27b   : > { %v1671_v63 = vpack.c.bf16 %v1645_v59, %v1644_v58  ;;  %3470 = vmatpush3.bf16.msra.mxu1 %v1669_v31  ;;  %v4555_v31 = vld [vmem:[%s4768_s4 + $0x30] sm:$0xff]  }
 0x27c   : > { %v1670_v1 = vpack.c.bf16 %v1643_v61, %v1642_v60  ;;  %v3461_v2 = vpop.f32.mrb[28].mxu0 }
 0x27d   : > { %v1632_v4 = vadd.f32 %v3461_v2, %v1616_v62  ;;  %v1587_v5 = vpop.f32.mrb[29].mxu0 }
 0x27e   : > { %v1630_v7 = vadd.f32 %v1614_v0, %v1587_v5  ;;  %v3462_v8 = vpop.f32.mrb[30].mxu0  ;;  %3471 = vmatprep.subr.bf16.mxu1 %v1670_v1 }
 0x27f   : > { %v1633_v9 = vadd.f32 %v3462_v8, %v1617_v3  ;;  %v1590_v10 = vpop.f32.mrb[31].mxu0  ;;  %3472 = vmatpush3.bf16.msra.mxu1 %v1670_v1  ;;  %v1648_v12 = vmax.f32 %v1632_v4, 0.0 }
 0x280   : > { %v1631_v11 = vadd.f32 %v1615_v6, %v1590_v10  ;;  %3473 = vmatprep.subr.bf16.mxu1 %v1671_v63  ;;  %v1646_v14 = vmax.f32 %v1630_v7, 0.0 }
 0x281   : > { %v1649_v13 = vmax.f32 %v1633_v9, 0.0 }
 0x282   : > { %v1647_v15 = vmax.f32 %v1631_v11, 0.0 }
 0x283   : > { %v1673_v17 = vpack.c.bf16 %v1649_v13, %v1648_v12  ;;  %3474 = vmatpush3.bf16.msra.mxu1 %v1671_v63 }
 0x284   : > { %v1672_v18 = vpack.c.bf16 %v1647_v15, %v1646_v14 }
 0x286   : > { %3475 = vmatprep.subr.bf16.mxu1 %v1672_v18 }
 0x287   : > { %3476 = vmatpush3.bf16.msra.mxu1 %v1672_v18 }
 0x288   : > { %3477 = vmatprep.subr.bf16.mxu1 %v1673_v17 }
 0x28b   : > { %3478 = vmatpush3.bf16.msra.mxu1 %v1673_v17 }
 0x28c   : > { %3495 = vmatprep.subr.bf16.mxu1 %v3983_v19 }
 0x28e   : > { %3480 = vmatmul.mubr.bf16.vlgmr.msra.gmra.mrb[32].mxu1 %v4514_v20 }
 0x28f   : > { %3483 = vmatprep.mubr.bf16.mxu1 %v4519_v21  ;;  %3496 = vmatpush3.bf16.msra.mxu1 %v3983_v19 }
 0x290   : > { %3497 = vmatprep.subr.bf16.mxu1 %v3985_v22 }
 0x293   : > { %3498 = vmatpush3.bf16.msra.mxu1 %v3985_v22 }
 0x294   : > { %3499 = vmatprep.subr.bf16.mxu1 %v3987_v23 }
 0x296   : > { %3484 = vmatmul.mubr.bf16.gmra.mrb[36].mxu1 %v4532_v24 }
 0x297   : > { %3487 = vmatprep.mubr.bf16.mxu1 %v4537_v25  ;;  %3500 = vmatpush3.bf16.msra.mxu1 %v3987_v23 }
 0x298   : > { %3501 = vmatprep.subr.bf16.mxu1 %v3989_v26 }
 0x29b   : > { %3502 = vmatpush3.bf16.msra.mxu1 %v3989_v26 }
 0x29c   : > { %3503 = vmatprep.subr.bf16.mxu1 %v3991_v27 }
 0x29e   : > { %3488 = vmatmul.mubr.bf16.gmra.mrb[40].mxu1 %v4550_v28 }
 0x29f   : > { %3491 = vmatprep.mubr.bf16.mxu1 %v4555_v31  ;;  %3504 = vmatpush3.bf16.msra.mxu1 %v3991_v27 }
 0x2a0   : > { %3505 = vmatprep.subr.bf16.mxu1 %v3993_v32 }
 0x2a3   : > { %3506 = vmatpush3.bf16.msra.mxu1 %v3993_v32 }
 0x2a4   : > { %3507 = vmatprep.subr.bf16.mxu1 %v3995_v33 }
 0x2a6   : > { %3492 = vmatmul.mubr.bf16.gmra.mrb[44].mxu1 %v4568_v34 }
 0x2a7   : > { %3508 = vmatpush3.bf16.msra.mxu1 %v3995_v33 }
 0x2a8   : > { %3509 = vmatprep.subr.bf16.mxu1 %v3997_v35 }
 0x2ab   : > { %3510 = vmatpush3.bf16.msra.mxu1 %v3997_v35 }
 0x361   : > { %v3481_v51 = vpop.f32.mrb[32].mxu1 }
 0x362   : > { %v1756_v52 = vpop.f32.mrb[33].mxu1 }
 0x363   : > { %v3482_v53 = vpop.f32.mrb[34].mxu1 }
 0x364   : > { %v1820_v54 = vpack.c.bf16 %v3482_v53, %v3481_v51  ;;  %v1759_v55 = vpop.f32.mrb[35].mxu1 }
 0x365   : > { %v1819_v56 = vpack.c.bf16 %v1759_v55, %v1756_v52 }
 0x367   : > { %3511 = vmatprep.mubr.bf16.mxu1 %v1819_v56  ;;  %3543 = vmatprep.mubr.bf16.mxu0 %v1819_v56 }
 0x368   : > { %3512 = vmatmul.mubr.bf16.vlgmr.msra.gmra.mrb[48].mxu1 %v1820_v54  ;;  %3544 = vmatmul.mubr.bf16.vlgmr.msra.gmra.mrb[32].mxu0 %v1820_v54 }
 0x369   : > { %v3485_v57 = vpop.f32.mrb[36].mxu1 }
 0x36a   : > { %v1772_v58 = vpop.f32.mrb[37].mxu1 }
 0x36b   : > { %v3486_v59 = vpop.f32.mrb[38].mxu1 }
 0x36c   : > { %v1822_v60 = vpack.c.bf16 %v3486_v59, %v3485_v57  ;;  %v1775_v61 = vpop.f32.mrb[39].mxu1 }
 0x36d   : > { %v1821_v62 = vpack.c.bf16 %v1775_v61, %v1772_v58 }
 0x36f   : > { %3515 = vmatprep.mubr.bf16.mxu1 %v1821_v62  ;;  %3547 = vmatprep.mubr.bf16.mxu0 %v1821_v62 }
 0x370   : > { %3516 = vmatmul.mubr.bf16.gmra.mrb[52].mxu1 %v1822_v60  ;;  %3548 = vmatmul.mubr.bf16.gmra.mrb[36].mxu0 %v1822_v60 }
 0x371   : > { %v3489_v63 = vpop.f32.mrb[40].mxu1 }
 0x372   : > { %v1788_v0 = vpop.f32.mrb[41].mxu1 }
 0x373   : > { %v3490_v1 = vpop.f32.mrb[42].mxu1 }
 0x374   : > { %v1824_v2 = vpack.c.bf16 %v3490_v1, %v3489_v63  ;;  %v1791_v3 = vpop.f32.mrb[43].mxu1 }
 0x375   : > { %v1823_v4 = vpack.c.bf16 %v1791_v3, %v1788_v0 }
 0x377   : > { %3519 = vmatprep.mubr.bf16.mxu1 %v1823_v4  ;;  %3551 = vmatprep.mubr.bf16.mxu0 %v1823_v4 }
 0x378   : > { %3520 = vmatmul.mubr.bf16.gmra.mrb[56].mxu1 %v1824_v2  ;;  %3552 = vmatmul.mubr.bf16.gmra.mrb[40].mxu0 %v1824_v2 }
 0x379   : > { %v3493_v5 = vpop.f32.mrb[44].mxu1 }
 0x37a   : > { %v1804_v6 = vpop.f32.mrb[45].mxu1 }
 0x37b   : > { %v3494_v7 = vpop.f32.mrb[46].mxu1 }
 0x37c   : > { %v1826_v8 = vpack.c.bf16 %v3494_v7, %v3493_v5  ;;  %v1807_v9 = vpop.f32.mrb[47].mxu1 }
 0x37d   : > { %v1825_v10 = vpack.c.bf16 %v1807_v9, %v1804_v6 }
 0x37f   : > { %3523 = vmatprep.mubr.bf16.mxu1 %v1825_v10  ;;  %3555 = vmatprep.mubr.bf16.mxu0 %v1825_v10 }
 0x380   : > { %3524 = vmatmul.mubr.bf16.gmra.mrb[60].mxu1 %v1826_v8  ;;  %3556 = vmatmul.mubr.bf16.gmra.mrb[44].mxu0 %v1826_v8 }
 0x381   : > { %3575 = vmatprep.mubr.bf16.mxu1 %v4308_v16  ;;  %3639 = vmatprep.mubr.bf16.mxu0 %v4436_v49 }
 0x43b   : > { %v3513_v11 = vpop.f32.mrb[48].mxu1  ;;  %v3545_v12 = vpop.f32.mrb[32].mxu0 }
 0x43c   : > { %v1925_v13 = vpop.f32.mrb[49].mxu1  ;;  %v2086_v14 = vpop.f32.mrb[33].mxu0 }
 0x43d   : > { %v3514_v15 = vpop.f32.mrb[50].mxu1  ;;  %v3546_v17 = vpop.f32.mrb[34].mxu0 }
 0x43e   : > { %v2150_v18 = vpack.c.bf16 %v3514_v15, %v3513_v11  ;;  %v2158_v19 = vpack.c.bf16 %v3546_v17, %v3545_v12  ;;  %v1928_v22 = vpop.f32.mrb[51].mxu1  ;;  %v2089_v23 = vpop.f32.mrb[35].mxu0 }
 0x43f   : > { %v2149_v26 = vpack.c.bf16 %v1928_v22, %v1925_v13  ;;  %v2157_v27 = vpack.c.bf16 %v2089_v23, %v2086_v14  ;;  %v2363_v23 = vld [vmem:[%s4776_s12 + $0x20] sm:$0xff] }
 0x441   : > { %3559 = vmatprep.subr.bf16.mxu1 %v2157_v27 }
 0x442   : > { %3560 = vmatpush3.bf16.msra.mxu1 %v2157_v27 }
 0x443   : > { %v3517_v32 = vpop.f32.mrb[52].mxu1  ;;  %v3549_v33 = vpop.f32.mrb[36].mxu0  ;;  %3561 = vmatprep.subr.bf16.mxu1 %v2158_v19 }
 0x444   : > { %v1941_v16 = vpop.f32.mrb[53].mxu1  ;;  %v2102_v35 = vpop.f32.mrb[37].mxu0 }
 0x445   : > { %v3518_v49 = vpop.f32.mrb[54].mxu1  ;;  %v3550_v50 = vpop.f32.mrb[38].mxu0 }
 0x446   : > { %v2152_v51 = vpack.c.bf16 %v3518_v49, %v3517_v32  ;;  %v2160_v52 = vpack.c.bf16 %v3550_v50, %v3549_v33  ;;  %v1944_v53 = vpop.f32.mrb[55].mxu1  ;;  %v2105_v54 = vpop.f32.mrb[39].mxu0  ;;  %3562 = vmatpush3.bf16.msra.mxu1 %v2158_v19  ;;  %v2365_v19 = vld [vmem:[%s4776_s12 + $0x30] sm:$0xff]  ;;  %v2366_v32 = vld [vmem:[%s4776_s12 + $0x38] sm:$0xff] }
 0x447   : > { %v2151_v55 = vpack.c.bf16 %v1944_v53, %v1941_v16  ;;  %v2159_v56 = vpack.c.bf16 %v2105_v54, %v2102_v35  ;;  %v2364_v35 = vld [vmem:[%s4776_s12 + $0x28] sm:$0xff] }
 0x449   : > { %3563 = vmatprep.subr.bf16.mxu1 %v2159_v56 }
 0x44a   : > { %3564 = vmatpush3.bf16.msra.mxu1 %v2159_v56 }
 0x44b   : > { %v3521_v57 = vpop.f32.mrb[56].mxu1  ;;  %v3553_v58 = vpop.f32.mrb[40].mxu0  ;;  %3565 = vmatprep.subr.bf16.mxu1 %v2160_v52 }
 0x44c   : > { %v1957_v59 = vpop.f32.mrb[57].mxu1  ;;  %v2118_v60 = vpop.f32.mrb[41].mxu0 }
 0x44d   : > { %v3522_v61 = vpop.f32.mrb[58].mxu1  ;;  %v3554_v62 = vpop.f32.mrb[42].mxu0 }
 0x44e   : > { %v2154_v63 = vpack.c.bf16 %v3522_v61, %v3521_v57  ;;  %v2162_v0 = vpack.c.bf16 %v3554_v62, %v3553_v58  ;;  %v1960_v1 = vpop.f32.mrb[59].mxu1  ;;  %v2121_v2 = vpop.f32.mrb[43].mxu0  ;;  %3566 = vmatpush3.bf16.msra.mxu1 %v2160_v52  ;;  %v2369_v58 = vld [vmem:[%s4776_s12 + $0x50] sm:$0xff] }
 0x44f   : > { %v2153_v3 = vpack.c.bf16 %v1960_v1, %v1957_v59  ;;  %v2161_v4 = vpack.c.bf16 %v2121_v2, %v2118_v60  ;;  %v2367_v60 = vld [vmem:[%s4776_s12 + $0x40] sm:$0xff]  ;;  %v2368_v2 = vld [vmem:[%s4776_s12 + $0x48] sm:$0xff] }
 0x451   : > { %3567 = vmatprep.subr.bf16.mxu1 %v2161_v4 }
 0x452   : > { %3568 = vmatpush3.bf16.msra.mxu1 %v2161_v4 }
 0x453   : > { %v3525_v5 = vpop.f32.mrb[60].mxu1  ;;  %v3557_v6 = vpop.f32.mrb[44].mxu0  ;;  %3569 = vmatprep.subr.bf16.mxu1 %v2162_v0 }
 0x454   : > { %v1973_v7 = vpop.f32.mrb[61].mxu1  ;;  %v2134_v8 = vpop.f32.mrb[45].mxu0 }
 0x455   : > { %v3526_v9 = vpop.f32.mrb[62].mxu1  ;;  %v3558_v10 = vpop.f32.mrb[46].mxu0 }
 0x456   : > { %v2156_v11 = vpack.c.bf16 %v3526_v9, %v3525_v5  ;;  %v2164_v12 = vpack.c.bf16 %v3558_v10, %v3557_v6  ;;  %v1976_v13 = vpop.f32.mrb[63].mxu1  ;;  %v2137_v14 = vpop.f32.mrb[47].mxu0  ;;  %3570 = vmatpush3.bf16.msra.mxu1 %v2162_v0 }
 0x457   : > { %v2155_v15 = vpack.c.bf16 %v1976_v13, %v1973_v7  ;;  %v2163_v17 = vpack.c.bf16 %v2137_v14, %v2134_v8  ;;  %v2371_v14 = vld [vmem:[%s4776_s12 + $0x60] sm:$0xff] }
 0x459   : > { %3571 = vmatprep.subr.bf16.mxu1 %v2163_v17 }
 0x45a   : > { %3572 = vmatpush3.bf16.msra.mxu1 %v2163_v17 }
 0x45b   : > { %3573 = vmatprep.subr.bf16.mxu1 %v2164_v12 }
 0x45e   : > { %3574 = vmatpush3.bf16.msra.mxu1 %v2164_v12  ;;  %v2373_v12 = vld [vmem:[%s4776_s12 + $0x70] sm:$0xff] }
 0x45f   : > { %3591 = vmatprep.subr.bf16.mxu1 %v2149_v26 }
 0x461   : > { %3576 = vmatmul.mubr.bf16.vlgmr.msra.gmra.mrb[64].mxu1 %v4330_v36  ;;  %v2361_v36 = vld [vmem:[%s4776_s12 + $0x10] sm:$0xff] }
 0x462   : > { %3592 = vmatpush3.bf16.msra.mxu1 %v2149_v26  ;;  %3579 = vmatprep.mubr.bf16.mxu1 %v4335_v37  ;;  %v2359_v37 = vld [vmem:[%s4776_s12] sm:$0xff] }
 0x463   : > { %3593 = vmatprep.subr.bf16.mxu1 %v2150_v18 }
 0x466   : > { %3594 = vmatpush3.bf16.msra.mxu1 %v2150_v18 }
 0x467   : > { %3595 = vmatprep.subr.bf16.mxu1 %v2151_v55 }
 0x469   : > { %3580 = vmatmul.mubr.bf16.gmra.mrb[68].mxu1 %v4345_v38 }
 0x46a   : > { %3596 = vmatpush3.bf16.msra.mxu1 %v2151_v55  ;;  %3583 = vmatprep.mubr.bf16.mxu1 %v4351_v39  ;;  %v2362_v39 = vld [vmem:[%s4776_s12 + $0x18] sm:$0xff] }
 0x46b   : > { %3597 = vmatprep.subr.bf16.mxu1 %v2152_v51 }
 0x46e   : > { %3598 = vmatpush3.bf16.msra.mxu1 %v2152_v51 }
 0x46f   : > { %3599 = vmatprep.subr.bf16.mxu1 %v2153_v3 }
 0x471   : > { %3584 = vmatmul.mubr.bf16.gmra.mrb[72].mxu1 %v4361_v30 }
 0x472   : > { %3600 = vmatpush3.bf16.msra.mxu1 %v2153_v3  ;;  %3587 = vmatprep.mubr.bf16.mxu1 %v4367_v29 }
 0x473   : > { %3601 = vmatprep.subr.bf16.mxu1 %v2154_v63 }
 0x476   : > { %3602 = vmatpush3.bf16.msra.mxu1 %v2154_v63  ;;  %v2370_v63 = vld [vmem:[%s4776_s12 + $0x58] sm:$0xff] }
 0x477   : > { %3603 = vmatprep.subr.bf16.mxu1 %v2155_v15 }
 0x479   : > { %3588 = vmatmul.mubr.bf16.gmra.mrb[76].mxu1 %v4377_v40  ;;  %v2360_v40 = vld [vmem:[%s4776_s12 + $0x8] sm:$0xff] }
 0x47a   : > { %3604 = vmatpush3.bf16.msra.mxu1 %v2155_v15  ;;  %3607 = vmatprep.mubr.bf16.mxu1 %v4383_v41 }
 0x47b   : > { %3605 = vmatprep.subr.bf16.mxu1 %v2156_v11 }
 0x47e   : > { %3606 = vmatpush3.bf16.msra.mxu1 %v2156_v11 }
 0x481   : > { %3608 = vmatmul.mubr.bf16.vlgmr.msra.gmra.mrb[64].mxu1 %v4393_v42 }
 0x482   : > { %3611 = vmatprep.mubr.bf16.mxu1 %v4399_v43 }
 0x489   : > { %3612 = vmatmul.mubr.bf16.gmra.mrb[68].mxu1 %v4406_v44 }
 0x48a   : > { %3615 = vmatprep.mubr.bf16.mxu1 %v4411_v45 }
 0x491   : > { %3616 = vmatmul.mubr.bf16.gmra.mrb[72].mxu1 %v4418_v46 }
 0x492   : > { %3619 = vmatprep.mubr.bf16.mxu1 %v4423_v47 }
 0x499   : > { %3620 = vmatmul.mubr.bf16.gmra.mrb[76].mxu1 %v4430_v48 }
 0x554   : > { %v3609_v38 = vpop.f32.mrb[64].mxu1 }
 0x555   : > { %v2377_v30 = vadd.f32 %v3609_v38, %v2361_v36  ;;  %v2296_v29 = vpop.f32.mrb[65].mxu1  ;;  %v2374_v36 = vld [vmem:[%s4776_s12 + $0x78] sm:$0xff] }
 0x556   : > { %v2375_v41 = vadd.f32 %v2359_v37, %v2296_v29  ;;  %v3610_v42 = vpop.f32.mrb[66].mxu1 }
 0x557   : > { %v2378_v43 = vadd.f32 %v3610_v42, %v2362_v39  ;;  %v2299_v44 = vpop.f32.mrb[67].mxu1  ;;  %v2393_v46 = vmax.f32 %v2377_v30, 0.0  ;;  %v2372_v39 = vld [vmem:[%s4776_s12 + $0x68] sm:$0xff] }
 0x558   : > { %v2376_v45 = vadd.f32 %v2360_v40, %v2299_v44  ;;  %v2391_v48 = vmax.f32 %v2375_v41, 0.0 }
 0x559   : > { %v2394_v47 = vmax.f32 %v2378_v43, 0.0 }
 0x55a   : > { %v2392_v18 = vmax.f32 %v2376_v45, 0.0 }
 0x55b   : > { %v2408_v22 = vpack.c.bf16 %v2394_v47, %v2393_v46 }
 0x55c   : > { %v2407_v26 = vpack.c.bf16 %v2392_v18, %v2391_v48  ;;  %v3613_v27 = vpop.f32.mrb[68].mxu1  ;;  %v2544_v18 = vld [vmem:[%s4778_s14] sm:$0xff] }
 0x55d   : > { %v2381_v33 = vadd.f32 %v3613_v27, %v2365_v19  ;;  %v2312_v16 = vpop.f32.mrb[69].mxu1  ;;  %v2545_v19 = vld [vmem:[%s4778_s14 + $0x8] sm:$0xff] }
 0x55e   : > { %v2379_v49 = vadd.f32 %v2363_v23, %v2312_v16  ;;  %v3614_v50 = vpop.f32.mrb[70].mxu1  ;;  %3623 = vmatprep.subr.bf16.mxu0 %v2407_v26  ;;  %v2546_v23 = vld [vmem:[%s4778_s14 + $0x10] sm:$0xff] }
 0x55f   : > { %v2382_v51 = vadd.f32 %v3614_v50, %v2366_v32  ;;  %v2315_v52 = vpop.f32.mrb[71].mxu1  ;;  %3624 = vmatpush3.bf16.msra.mxu0 %v2407_v26  ;;  %v2397_v54 = vmax.f32 %v2381_v33, 0.0  ;;  %v2547_v26 = vld [vmem:[%s4778_s14 + $0x18] sm:$0xff]  ;;  %v2548_v32 = vld [vmem:[%s4778_s14 + $0x20] sm:$0xff]  ;;  %v2549_v33 = vld [vmem:[%s4778_s14 + $0x28] sm:$0xff] }
 0x560   : > { %v2380_v53 = vadd.f32 %v2364_v35, %v2315_v52  ;;  %3625 = vmatprep.subr.bf16.mxu0 %v2408_v22  ;;  %v2395_v56 = vmax.f32 %v2379_v49, 0.0  ;;  %v3771_v27 = vpack.c.bf16 %v2547_v26, %v2546_v23  ;;  %v3775_v16 = vpack.c.bf16 %v2549_v33, %v2548_v32  ;;  %v2550_v35 = vld [vmem:[%s4778_s14 + $0x30] sm:$0xff]  ;;  %v2551_v49 = vld [vmem:[%s4778_s14 + $0x38] sm:$0xff]  ;;  %v4003_v26 = vld [vmem:[#allocation2 + $0x20] sm:$0xff] }
 0x561   : > { %v2398_v55 = vmax.f32 %v2382_v51, 0.0  ;;  %v3779_v50 = vpack.c.bf16 %v2551_v49, %v2550_v35  ;;  %v2554_v52 = vld [vmem:[%s4778_s14 + $0x50] sm:$0xff]  ;;  %v4002_v23 = vld [vmem:[#allocation2 + $0x18] sm:$0xff]  ;;  %v4008_v35 = vld [vmem:[#allocation2 + $0x48] sm:$0xff] }
 0x562   : > { %v2396_v57 = vmax.f32 %v2380_v53, 0.0  ;;  %v2555_v53 = vld [vmem:[%s4778_s14 + $0x58] sm:$0xff]  ;;  %v4005_v32 = vld [vmem:[#allocation2 + $0x30] sm:$0xff] }
 0x563   : > { %v2410_v59 = vpack.c.bf16 %v2398_v55, %v2397_v54  ;;  %3626 = vmatpush3.bf16.msra.mxu0 %v2408_v22  ;;  %v3767_v22 = vpack.c.bf16 %v2545_v19, %v2544_v18  ;;  %v3787_v54 = vpack.c.bf16 %v2555_v53, %v2554_v52  ;;  %v3999_v18 = vld [vmem:[#allocation2] sm:$0xff]  ;;  %v4000_v19 = vld [vmem:[#allocation2 + $0x8] sm:$0xff]  ;;  %v4006_v33 = vld [vmem:[#allocation2 + $0x38] sm:$0xff] }
 0x564   : > { %v2409_v61 = vpack.c.bf16 %v2396_v57, %v2395_v56  ;;  %v3617_v62 = vpop.f32.mrb[72].mxu1  ;;  %v2558_v56 = vld [vmem:[%s4778_s14 + $0x70] sm:$0xff]  ;;  %v4014_v52 = vld [vmem:[#allocation2 + $0x78] sm:$0xff] }
 0x565   : > { %v2385_v0 = vadd.f32 %v3617_v62, %v2369_v58  ;;  %v2328_v1 = vpop.f32.mrb[73].mxu1  ;;  %v4009_v49 = vld [vmem:[#allocation2 + $0x50] sm:$0xff] }
 0x566   : > { %v2383_v3 = vadd.f32 %v2367_v60, %v2328_v1  ;;  %v3618_v4 = vpop.f32.mrb[74].mxu1  ;;  %3627 = vmatprep.subr.bf16.mxu0 %v2409_v61  ;;  %v2531_v60 = vld [vmem:[%s4777_s13 + $0x18] sm:$0xff] }
 0x567   : > { %v2386_v5 = vadd.f32 %v3618_v4, %v2370_v63  ;;  %v2331_v6 = vpop.f32.mrb[75].mxu1  ;;  %3628 = vmatpush3.bf16.msra.mxu0 %v2409_v61  ;;  %v2401_v8 = vmax.f32 %v2385_v0, 0.0 }
 0x568   : > { %v2384_v7 = vadd.f32 %v2368_v2, %v2331_v6  ;;  %3629 = vmatprep.subr.bf16.mxu0 %v2410_v59  ;;  %v2399_v10 = vmax.f32 %v2383_v3, 0.0  ;;  %v2532_v2 = vld [vmem:[%s4777_s13 + $0x20] sm:$0xff]  ;;  %v2533_v3 = vld [vmem:[%s4777_s13 + $0x28] sm:$0xff]  ;;  %v2535_v6 = vld [vmem:[%s4777_s13 + $0x38] sm:$0xff] }
 0x569   : > { %v2402_v9 = vmax.f32 %v2386_v5, 0.0  ;;  %v3807_v4 = vpack.c.bf16 %v2533_v3, %v2532_v2  ;;  %v2534_v5 = vld [vmem:[%s4777_s13 + $0x30] sm:$0xff] }
 0x56a   : > { %v2400_v11 = vmax.f32 %v2384_v7, 0.0 }
 0x56b   : > { %v2412_v13 = vpack.c.bf16 %v2402_v9, %v2401_v8  ;;  %3630 = vmatpush3.bf16.msra.mxu0 %v2410_v59  ;;  %v2530_v59 = vld [vmem:[%s4777_s13 + $0x10] sm:$0xff] }
 0x56c   : > { %v2411_v15 = vpack.c.bf16 %v2400_v11, %v2399_v10  ;;  %v3621_v17 = vpop.f32.mrb[76].mxu1  ;;  %v3803_v0 = vpack.c.bf16 %v2531_v60, %v2530_v59  ;;  %v3811_v10 = vpack.c.bf16 %v2535_v6, %v2534_v5 }
 0x56d   : > { %v2389_v37 = vadd.f32 %v3621_v17, %v2373_v12  ;;  %v2344_v38 = vpop.f32.mrb[77].mxu1  ;;  %v2536_v12 = vld [vmem:[%s4777_s13 + $0x40] sm:$0xff]  ;;  %v2539_v17 = vld [vmem:[%s4777_s13 + $0x58] sm:$0xff] }
 0x56e   : > { %v2387_v30 = vadd.f32 %v2371_v14, %v2344_v38  ;;  %v3622_v29 = vpop.f32.mrb[78].mxu1  ;;  %3631 = vmatprep.subr.bf16.mxu0 %v2411_v15 }
 0x56f   : > { %v2390_v40 = vadd.f32 %v3622_v29, %v2374_v36  ;;  %v2347_v41 = vpop.f32.mrb[79].mxu1  ;;  %3632 = vmatpush3.bf16.msra.mxu0 %v2411_v15  ;;  %v2405_v43 = vmax.f32 %v2389_v37, 0.0  ;;  %v2538_v15 = vld [vmem:[%s4777_s13 + $0x50] sm:$0xff]  ;;  %v2540_v29 = vld [vmem:[%s4777_s13 + $0x60] sm:$0xff] }
 0x570   : > { %v2388_v42 = vadd.f32 %v2372_v39, %v2347_v41  ;;  %3633 = vmatprep.subr.bf16.mxu0 %v2412_v13  ;;  %v2403_v45 = vmax.f32 %v2387_v30, 0.0  ;;  %v3819_v39 = vpack.c.bf16 %v2539_v17, %v2538_v15 }
 0x571   : > { %v2406_v44 = vmax.f32 %v2390_v40, 0.0  ;;  %v2541_v40 = vld [vmem:[%s4777_s13 + $0x68] sm:$0xff] }
 0x572   : > { %v2404_v46 = vmax.f32 %v2388_v42, 0.0  ;;  %v3823_v41 = vpack.c.bf16 %v2541_v40, %v2540_v29  ;;  %v2542_v42 = vld [vmem:[%s4777_s13 + $0x70] sm:$0xff] }
 0x573   : > { %v2414_v47 = vpack.c.bf16 %v2406_v44, %v2405_v43  ;;  %3634 = vmatpush3.bf16.msra.mxu0 %v2412_v13  ;;  %v2537_v13 = vld [vmem:[%s4777_s13 + $0x48] sm:$0xff]  ;;  %v2543_v43 = vld [vmem:[%s4777_s13 + $0x78] sm:$0xff] }
 0x574   : > { %v2413_v48 = vpack.c.bf16 %v2404_v46, %v2403_v45  ;;  %v3815_v14 = vpack.c.bf16 %v2537_v13, %v2536_v12 }
 0x576   : > { %3635 = vmatprep.subr.bf16.mxu0 %v2413_v48 }
 0x577   : > { %3636 = vmatpush3.bf16.msra.mxu0 %v2413_v48 }
 0x578   : > { %3637 = vmatprep.subr.bf16.mxu0 %v2414_v47 }
 0x57b   : > { %3638 = vmatpush3.bf16.msra.mxu0 %v2414_v47  ;;  %v3827_v47 = vpack.c.bf16 %v2543_v43, %v2542_v42 }
 0x57c   : > { %3768 = vmatprep.subr.bf16.mxu0 %v3767_v22 }
 0x57e   : > { %3640 = vmatmul.mubr.bf16.vlgmr.msra.gmra.mrb[48].mxu0 %v4514_v20  ;;  %v2552_v20 = vld [vmem:[%s4778_s14 + $0x40] sm:$0xff] }
 0x57f   : > { %3643 = vmatprep.mubr.bf16.mxu0 %v4519_v21  ;;  %3770 = vmatpush3.bf16.msra.mxu0 %v3767_v22  ;;  %v2553_v21 = vld [vmem:[%s4778_s14 + $0x48] sm:$0xff]  ;;  %v4001_v22 = vld [vmem:[#allocation2 + $0x10] sm:$0xff] }
 0x580   : > { %3772 = vmatprep.subr.bf16.mxu0 %v3771_v27  ;;  %v3783_v51 = vpack.c.bf16 %v2553_v21, %v2552_v20  ;;  %v4011_v20 = vld [vmem:[#allocation2 + $0x60] sm:$0xff]  ;;  %v4012_v21 = vld [vmem:[#allocation2 + $0x68] sm:$0xff] }
 0x583   : > { %3774 = vmatpush3.bf16.msra.mxu0 %v3771_v27  ;;  %v4004_v27 = vld [vmem:[#allocation2 + $0x28] sm:$0xff] }
 0x584   : > { %3776 = vmatprep.subr.bf16.mxu0 %v3775_v16 }
 0x586   : > { %3644 = vmatmul.mubr.bf16.gmra.mrb[52].mxu0 %v4532_v24  ;;  %v2556_v24 = vld [vmem:[%s4778_s14 + $0x60] sm:$0xff] }
 0x587   : > { %3647 = vmatprep.mubr.bf16.mxu0 %v4537_v25  ;;  %3778 = vmatpush3.bf16.msra.mxu0 %v3775_v16  ;;  %v2557_v25 = vld [vmem:[%s4778_s14 + $0x68] sm:$0xff]  ;;  %v4007_v16 = vld [vmem:[#allocation2 + $0x40] sm:$0xff] }
 0x588   : > { %3780 = vmatprep.subr.bf16.mxu0 %v3779_v50  ;;  %v3791_v55 = vpack.c.bf16 %v2557_v25, %v2556_v24 }
 0x58b   : > { %3782 = vmatpush3.bf16.msra.mxu0 %v3779_v50  ;;  %v4010_v50 = vld [vmem:[#allocation2 + $0x58] sm:$0xff] }
 0x58c   : > { %3784 = vmatprep.subr.bf16.mxu0 %v3783_v51 }
 0x58e   : > { %3648 = vmatmul.mubr.bf16.gmra.mrb[56].mxu0 %v4550_v28  ;;  %v2559_v28 = vld [vmem:[%s4778_s14 + $0x78] sm:$0xff] }
 0x58f   : > { %3651 = vmatprep.mubr.bf16.mxu0 %v4555_v31  ;;  %3786 = vmatpush3.bf16.msra.mxu0 %v3783_v51  ;;  %v3795_v57 = vpack.c.bf16 %v2559_v28, %v2558_v56  ;;  %v2528_v31 = vld [vmem:[%s4777_s13] sm:$0xff]  ;;  %v4013_v51 = vld [vmem:[#allocation2 + $0x70] sm:$0xff] }
 0x590   : > { %3788 = vmatprep.subr.bf16.mxu0 %v3787_v54 }
 0x593   : > { %3790 = vmatpush3.bf16.msra.mxu0 %v3787_v54 }
 0x594   : > { %3792 = vmatprep.subr.bf16.mxu0 %v3791_v55 }
 0x596   : > { %3652 = vmatmul.mubr.bf16.gmra.mrb[60].mxu0 %v4568_v34  ;;  %v2529_v34 = vld [vmem:[%s4777_s13 + $0x8] sm:$0xff] }
 0x597   : > { %3794 = vmatpush3.bf16.msra.mxu0 %v3791_v55  ;;  %v3799_v58 = vpack.c.bf16 %v2529_v34, %v2528_v31 }
 0x598   : > { %3796 = vmatprep.subr.bf16.mxu0 %v3795_v57 }
 0x59b   : > { %3798 = vmatpush3.bf16.msra.mxu0 %v3795_v57 }
 0x59c   : > { %3800 = vmatprep.subr.bf16.mxu0 %v3799_v58 }
 0x651   : > { %v3641_v61 = vpop.f32.mrb[48].mxu0 }
 0x652   : > { %2514 = vst [vmem:[%s4119_s28 + $0x10] sm:$0xff] %v3641_v61  ;;  %v2449_v62 = vpop.f32.mrb[49].mxu0 }
 0x653   : > { %2512 = vst [vmem:[%s4119_s28] sm:$0xff] %v2449_v62  ;;  %v3642_v63 = vpop.f32.mrb[50].mxu0  ;;  %3687 = vmatprep.mubr.f32.mxu0 %v2449_v62 }
 0x654   : > { %2515 = vst [vmem:[%s4119_s28 + $0x18] sm:$0xff] %v3642_v63  ;;  %v2452_v1 = vpop.f32.mrb[51].mxu0 }
 0x655   : > { %2513 = vst [vmem:[%s4119_s28 + $0x8] sm:$0xff] %v2452_v1  ;;  %3688 = vmatmul.mubr.f32.vlgmr.msra.gmra.mrb[64].mxu0 %v2452_v1 }
 0x656   : > { %3690 = vmatprep.mubr.f32.mxu0 %v3641_v61  ;;  %3802 = vmatpush3.bf16.msra.mxu0 %v3799_v58 }
 0x657   : > { %3804 = vmatprep.subr.bf16.mxu0 %v3803_v0 }
 0x659   : > { %v3645_v7 = vpop.f32.mrb[52].mxu0  ;;  %3691 = vmatmul.mubr.f32.gmra.mrb[66].mxu0 %v3642_v63 }
 0x65a   : > { %2518 = vst [vmem:[%s4119_s28 + $0x30] sm:$0xff] %v3645_v7  ;;  %v2465_v8 = vpop.f32.mrb[53].mxu0  ;;  %3806 = vmatpush3.bf16.msra.mxu0 %v3803_v0 }
 0x65b   : > { %2516 = vst [vmem:[%s4119_s28 + $0x20] sm:$0xff] %v2465_v8  ;;  %v3646_v9 = vpop.f32.mrb[54].mxu0  ;;  %3693 = vmatprep.mubr.f32.mxu0 %v2465_v8  ;;  %3808 = vmatprep.subr.bf16.mxu0 %v3807_v4 }
 0x65c   : > { %2519 = vst [vmem:[%s4119_s28 + $0x38] sm:$0xff] %v3646_v9  ;;  %v2468_v11 = vpop.f32.mrb[55].mxu0 }
 0x65d   : > { %2517 = vst [vmem:[%s4119_s28 + $0x28] sm:$0xff] %v2468_v11  ;;  %3694 = vmatmul.mubr.f32.gmra.mrb[68].mxu0 %v2468_v11 }
 0x65e   : > { %3696 = vmatprep.mubr.f32.mxu0 %v3645_v7  ;;  %3810 = vmatpush3.bf16.msra.mxu0 %v3807_v4 }
 0x65f   : > { %3812 = vmatprep.subr.bf16.mxu0 %v3811_v10 }
 0x661   : > { %v3649_v36 = vpop.f32.mrb[56].mxu0  ;;  %3697 = vmatmul.mubr.f32.gmra.mrb[70].mxu0 %v3646_v9 }
 0x662   : > { %2522 = vst [vmem:[%s4119_s28 + $0x50] sm:$0xff] %v3649_v36  ;;  %v2481_v37 = vpop.f32.mrb[57].mxu0  ;;  %3814 = vmatpush3.bf16.msra.mxu0 %v3811_v10 }
 0x663   : > { %2520 = vst [vmem:[%s4119_s28 + $0x40] sm:$0xff] %v2481_v37  ;;  %v3650_v38 = vpop.f32.mrb[58].mxu0  ;;  %3699 = vmatprep.mubr.f32.mxu0 %v2481_v37  ;;  %3816 = vmatprep.subr.bf16.mxu0 %v3815_v14 }
 0x664   : > { %2523 = vst [vmem:[%s4119_s28 + $0x58] sm:$0xff] %v3650_v38  ;;  %v2484_v30 = vpop.f32.mrb[59].mxu0 }
 0x665   : > { %2521 = vst [vmem:[%s4119_s28 + $0x48] sm:$0xff] %v2484_v30  ;;  %3700 = vmatmul.mubr.f32.gmra.mrb[72].mxu0 %v2484_v30 }
 0x666   : > { %3702 = vmatprep.mubr.f32.mxu0 %v3649_v36  ;;  %3818 = vmatpush3.bf16.msra.mxu0 %v3815_v14 }
 0x667   : > { %3820 = vmatprep.subr.bf16.mxu0 %v3819_v39 }
 0x669   : > { %v3653_v44 = vpop.f32.mrb[60].mxu0  ;;  %3703 = vmatmul.mubr.f32.gmra.mrb[74].mxu0 %v3650_v38 }
 0x66a   : > { %2526 = vst [vmem:[%s4119_s28 + $0x70] sm:$0xff] %v3653_v44  ;;  %v2497_v45 = vpop.f32.mrb[61].mxu0  ;;  %3822 = vmatpush3.bf16.msra.mxu0 %v3819_v39 }
 0x66b   : > { %2524 = vst [vmem:[%s4119_s28 + $0x60] sm:$0xff] %v2497_v45  ;;  %v3654_v46 = vpop.f32.mrb[62].mxu0  ;;  %3705 = vmatprep.mubr.f32.mxu0 %v2497_v45  ;;  %3824 = vmatprep.subr.bf16.mxu0 %v3823_v41 }
 0x66c   : > { %2527 = vst [vmem:[%s4119_s28 + $0x78] sm:$0xff] %v3654_v46  ;;  %v2500_v48 = vpop.f32.mrb[63].mxu0 }
 0x66d   : > { %2525 = vst [vmem:[%s4119_s28 + $0x68] sm:$0xff] %v2500_v48  ;;  %3706 = vmatmul.mubr.f32.gmra.mrb[76].mxu0 %v2500_v48 }
 0x66e   : > { %3708 = vmatprep.mubr.f32.mxu0 %v3653_v44  ;;  %3826 = vmatpush3.bf16.msra.mxu0 %v3823_v41 }
 0x66f   : > { %3828 = vmatprep.subr.bf16.mxu0 %v3827_v47 }
 0x671   : > { %3709 = vmatmul.mubr.f32.gmra.mrb[78].mxu0 %v3654_v46 }
 0x672   : > { %3830 = vmatpush3.bf16.msra.mxu0 %v3827_v47  ;;  %3743 = vmatprep.mubr.f32.mxu0 %v3999_v18 }
 0x675   : > { %3744 = vmatmul.mubr.f32.vlgmr.msra.gmra.mrb[64].mxu0 %v4000_v19 }
 0x676   : > { %3746 = vmatprep.mubr.f32.mxu0 %v4001_v22 }
 0x679   : > { %3747 = vmatmul.mubr.f32.gmra.mrb[66].mxu0 %v4002_v23 }
 0x67a   : > { %3749 = vmatprep.mubr.f32.mxu0 %v4003_v26 }
 0x67d   : > { %3750 = vmatmul.mubr.f32.gmra.mrb[68].mxu0 %v4004_v27 }
 0x67e   : > { %3752 = vmatprep.mubr.f32.mxu0 %v4005_v32 }
 0x681   : > { %3753 = vmatmul.mubr.f32.gmra.mrb[70].mxu0 %v4006_v33 }
 0x682   : > { %3755 = vmatprep.mubr.f32.mxu0 %v4007_v16 }
 0x685   : > { %3756 = vmatmul.mubr.f32.gmra.mrb[72].mxu0 %v4008_v35 }
 0x686   : > { %3758 = vmatprep.mubr.f32.mxu0 %v4009_v49 }
 0x689   : > { %3759 = vmatmul.mubr.f32.gmra.mrb[74].mxu0 %v4010_v50 }
 0x68a   : > { %3761 = vmatprep.mubr.f32.mxu0 %v4011_v20 }
 0x68d   : > { %3762 = vmatmul.mubr.f32.gmra.mrb[76].mxu0 %v4012_v21 }
 0x68e   : > { %3764 = vmatprep.mubr.f32.mxu0 %v4013_v51 }
 0x691   : > { %3765 = vmatmul.mubr.f32.gmra.mrb[78].mxu0 %v4014_v52 }
 0x748   : > { %v3745_v53 = vpop.f32.mrb[64].mxu0 }
 0x749   : > { %2851 = vst [vmem:[#allocation2 + $0x8] sm:$0xff] %v3745_v53  ;;  %v2771_v54 = vpop.f32.mrb[65].mxu0 }
 0x74a   : > { %2850 = vst [vmem:[#allocation2] sm:$0xff] %v2771_v54 }
 0x74c   : > { %v3748_v24 = vpop.f32.mrb[66].mxu0 }
 0x74d   : > { %2853 = vst [vmem:[#allocation2 + $0x18] sm:$0xff] %v3748_v24  ;;  %v2781_v25 = vpop.f32.mrb[67].mxu0 }
 0x74e   : > { %2852 = vst [vmem:[#allocation2 + $0x10] sm:$0xff] %v2781_v25 }
 0x750   : > { %v3751_v55 = vpop.f32.mrb[68].mxu0 }
 0x751   : > { %2855 = vst [vmem:[#allocation2 + $0x28] sm:$0xff] %v3751_v55  ;;  %v2791_v56 = vpop.f32.mrb[69].mxu0 }
 0x752   : > { %2854 = vst [vmem:[#allocation2 + $0x20] sm:$0xff] %v2791_v56 }
 0x754   : > { %v3754_v28 = vpop.f32.mrb[70].mxu0 }
 0x755   : > { %2857 = vst [vmem:[#allocation2 + $0x38] sm:$0xff] %v3754_v28  ;;  %v2801_v57 = vpop.f32.mrb[71].mxu0 }
 0x756   : > { %2856 = vst [vmem:[#allocation2 + $0x30] sm:$0xff] %v2801_v57 }
 0x758   : > { %v3757_v31 = vpop.f32.mrb[72].mxu0 }
 0x759   : > { %2859 = vst [vmem:[#allocation2 + $0x48] sm:$0xff] %v3757_v31  ;;  %v2811_v34 = vpop.f32.mrb[73].mxu0 }
 0x75a   : > { %2858 = vst [vmem:[#allocation2 + $0x40] sm:$0xff] %v2811_v34 }
 0x75c   : > { %v3760_v58 = vpop.f32.mrb[74].mxu0 }
 0x75d   : > { %2861 = vst [vmem:[#allocation2 + $0x58] sm:$0xff] %v3760_v58  ;;  %v2821_v59 = vpop.f32.mrb[75].mxu0 }
 0x75e   : > { %2860 = vst [vmem:[#allocation2 + $0x50] sm:$0xff] %v2821_v59 }
 0x760   : > { %v3763_v60 = vpop.f32.mrb[76].mxu0 }
 0x761   : > { %2863 = vst [vmem:[#allocation2 + $0x68] sm:$0xff] %v3763_v60  ;;  %v2831_v61 = vpop.f32.mrb[77].mxu0 }
 0x762   : > { %2862 = vst [vmem:[#allocation2 + $0x60] sm:$0xff] %v2831_v61 }
 0x764   : > { %v3766_v62 = vpop.f32.mrb[78].mxu0 }
 0x765   : > { %2865 = vst [vmem:[#allocation2 + $0x78] sm:$0xff] %v3766_v62  ;;  %v2841_v63 = vpop.f32.mrb[79].mxu0 }
 0x766   : > { %2864 = vst [vmem:[#allocation2 + $0x70] sm:$0xff] %v2841_v63 }
 0x767 PF: > { %s4782_s28 = sld [smem:[#allocation3_spill]] }
 0x76d   : > { %s25_s18 = sadd.s32 1, %s4782_s28  }
 0x76e   : > { %p22_p5 = scmp.ge.s32.totalorder %s25_s18, 4  }
 0x770   :  { %24 = sbr.rel (!%p22_p5) target bundleno = 1 (0x1), region = 114 }

</bundles_post_ra>
